<compile_context>
chip_gen: v5e
topology: v5e:2x2
jax: 0.10.0
libtpu: 0.0.40
codegen_flags: <defaults>
</compile_context>

<pallas_src>
import jax
import jax.numpy as jnp
from jax import lax
from jax.experimental import pallas as pl
from jax.experimental.pallas import tpu as pltpu


def _round_up(x, m):
    return ((x + m - 1) // m) * m


def _mlstm_chunk_kernel(xwb_ref, h0_ref, wh_ref, out_ref, h_scratch):
    """One grid step == CHUNK timesteps of the recurrence.

    xwb_ref : (CHUNK, 3*Gp) f32  precomputed x@wx + b, gate order [i, o, c]
    h0_ref  : (1, Gp)       f32  initial hidden state (VMEM-resident)
    wh_ref  : (Gp, 3*Gp)         fused hidden->gate weights (VMEM-resident)
    out_ref : (CHUNK, 2*Gp)      cols [0,Gp)=hidden, [Gp,2Gp)=memory
    h_scratch: (1, Gp) f32       hidden-state carry across grid steps
    """
    c = pl.program_id(0)
    chunk = xwb_ref.shape[0]
    gp = h_scratch.shape[-1]

    @pl.when(c == 0)
    def _():
        h_scratch[...] = h0_ref[...]

    # Load the resident weights once per chunk, outside the inner loop.
    wh = wh_ref[...]
    cdt = wh.dtype  # matmul operand dtype (f32 or bf16); accumulation is f32

    def step(i, h):
        # h: (1, Gp) f32 carried in vregs within the chunk.
        gates = (
            jnp.dot(h.astype(cdt), wh, preferred_element_type=jnp.float32)
            + xwb_ref[pl.ds(i, 1), :]
        )  # (1, 3*Gp), gate order [i, o, c], lane-aligned per gate

        i_gate = jax.nn.sigmoid(gates[:, 0 * gp:1 * gp])
        o_gate = jax.nn.sigmoid(gates[:, 1 * gp:2 * gp])
        c_tilde = jnp.tanh(gates[:, 2 * gp:3 * gp])

        memory_cell = i_gate * c_tilde
        hidden_state = o_gate * jnp.tanh(memory_cell)

        # Lane-aligned (128-wide) stores into the chunk output block.
        out_ref[pl.ds(i, 1), 0 * gp:1 * gp] = hidden_state.astype(out_ref.dtype)
        out_ref[pl.ds(i, 1), 1 * gp:2 * gp] = memory_cell.astype(out_ref.dtype)
        return hidden_state

    h_final = lax.fori_loop(0, chunk, step, h_scratch[...], unroll=True)
    h_scratch[...] = h_final  # carry to the next chunk


def mlstm_sequence_pallas(xs, hidden_state, params, *, chunk=8):
    """Run the MLSTM cell over a sequence xs: (T, input_size).

    Returns (hidden_states: (T, H), memory_cells: (T, H)).
    """
    T, input_size = xs.shape
    H = params["hidden_size"]
    Gp = params["gate_stride"]
    out_dtype = xs.dtype

    wx, wh, b = params["wx"], params["wh"], params["b"]
    cdt = wx.dtype

    if hidden_state is None:
        hidden_state = jnp.zeros((H,), out_dtype)
    h0 = jnp.zeros((1, Gp), jnp.float32)
    h0 = h0.at[0, :H].set(hidden_state.astype(jnp.float32))

    # --- Hoisted input path: one batched matmul outside the serial loop. ---
    # (T, I) x (I, 3*Gp) with f32 accumulation; bias folded in here so the
    # recurrent body does a single small matmul + add.
    xwb = jnp.dot(xs.astype(cdt), wx, preferred_element_type=jnp.float32) + b

    # Pad T to a multiple of CHUNK (>= 8 keeps output stores sublane-dense).
    chunk = max(8, int(chunk))
    T_pad = _round_up(T, chunk)
    if T_pad != T:
        xwb = jnp.pad(xwb, ((0, T_pad - T), (0, 0)))
    num_chunks = T_pad // chunk

    # Explicit VMEM budget: double-buffered streamed blocks + resident weights.
    # Raise this as H grows (v5e/v6e); keep below ~60 MiB on v7x (64 MiB phys).
    itemsize_out = jnp.dtype(out_dtype).itemsize
    itemsize_w = jnp.dtype(cdt).itemsize
    est = (2 * chunk * 3 * Gp * 4
           + 2 * chunk * 2 * Gp * itemsize_out
           + 2 * Gp * 3 * Gp * itemsize_w
           + 2 * Gp * 4
           + Gp * 4)
    vmem_limit = int(max(32 * 1024 * 1024, min(2 * est, 60 * 1024 * 1024)))

    out = pl.pallas_call(
        _mlstm_chunk_kernel,
        out_shape=jax.ShapeDtypeStruct((T_pad, 2 * Gp), out_dtype),
        grid=(num_chunks,),
        in_specs=[
            pl.BlockSpec((chunk, 3 * Gp), lambda c: (c, 0)),   # xwb streamed per chunk
            pl.BlockSpec((1, Gp), lambda c: (0, 0)),           # h0 resident
            pl.BlockSpec((Gp, 3 * Gp), lambda c: (0, 0)),      # wh resident
        ],
        out_specs=pl.BlockSpec((chunk, 2 * Gp), lambda c: (c, 0)),
        scratch_shapes=[pltpu.VMEM((1, Gp), jnp.float32)],
        compiler_params=pltpu.CompilerParams(
            # Time/chunk axis is a strict recurrence: must stay "arbitrary".
            dimension_semantics=("arbitrary",),
            vmem_limit_bytes=vmem_limit,
        ),
    )(xwb, h0, wh)

    hidden_states = out[:T, 0 * Gp:0 * Gp + H]
    memory_cells = out[:T, 1 * Gp:1 * Gp + H]
    return hidden_states, memory_cells


def mlstm_cell_pallas(x, hidden_state, memory_cell, params):
    """Single-step API matching MLSTMCell.forward(x, hidden_state, memory_cell)."""
    del memory_cell  # accepted for parity; forward overwrites it unconditionally
    hs, ms = mlstm_sequence_pallas(x[None, :], hidden_state, params)
    return hs[0], ms[0]


def make_params(key, input_size, hidden_size, param_dtype=jnp.float32):
    """Deterministic PyTorch-Linear-style init, fused into [i, o, c] gate order.

    The d-gate Linear layers are sampled (to keep key consumption identical to
    the torch module's declaration order [d, i, o, c]) but dropped from the
    fused weights, since the d-gate never affects forward's outputs.

    Kernel layout: each gate is padded to a 128-lane stride Gp, and wh rows
    are padded to Gp, so all gate slices / output stores are lane-aligned.
    """
    H = hidden_size
    Gp = max(128, _round_up(H, 128))

    keys = jax.random.split(key, 16)
    k = iter(keys)

    def linear(kw, kb, in_f, out_f):
        bound = float(in_f) ** -0.5
        w = jax.random.uniform(kw, (out_f, in_f), jnp.float32, -bound, bound)
        b = jax.random.uniform(kb, (out_f,), jnp.float32, -bound, bound)
        return w, b

    u_layers = [linear(next(k), next(k), H, H) for _ in range(4)]
    w_layers = [linear(next(k), next(k), input_size, H) for _ in range(4)]
    u_layers, w_layers = u_layers[1:], w_layers[1:]   # drop dead d-gate -> [i, o, c]

    # Raw fused (unpadded) weights, used by the pure-JAX reference.
    wh_raw = jnp.concatenate([w.T for (w, _) in u_layers], axis=1)   # (H, 3H)
    wx_raw = jnp.concatenate([w.T for (w, _) in w_layers], axis=1)   # (I, 3H)
    b_raw = (jnp.concatenate([bu for (_, bu) in u_layers])
             + jnp.concatenate([bw for (_, bw) in w_layers]))        # (3H,)

    # Gate-stride-padded kernel layout (padded lanes/rows are exactly zero).
    wx = jnp.zeros((input_size, 3 * Gp), jnp.float32)
    wh = jnp.zeros((Gp, 3 * Gp), jnp.float32)
    b = jnp.zeros((1, 3 * Gp), jnp.float32)
    for g in range(3):
        wx = wx.at[:, g * Gp:g * Gp + H].set(wx_raw[:, g * H:(g + 1) * H])
        wh = wh.at[:H, g * Gp:g * Gp + H].set(wh_raw[:, g * H:(g + 1) * H])
        b = b.at[0, g * Gp:g * Gp + H].set(b_raw[g * H:(g + 1) * H])

    return {
        "wx": wx.astype(param_dtype),
        "wh": wh.astype(param_dtype),
        "b": b,                                   # bias stays f32
        "wx_raw": wx_raw.astype(param_dtype),
        "wh_raw": wh_raw.astype(param_dtype),
        "b_raw": b_raw,
        "hidden_size": H,
        "gate_stride": Gp,
    }


def mlstm_sequence_ref(xs, hidden_state, params):
    """Pure-JAX reference on the UNPADDED weights (validates padding too)."""
    H = params["hidden_size"]
    cdt = params["wx_raw"].dtype
    if hidden_state is None:
        hidden_state = jnp.zeros((H,), xs.dtype)
    h = hidden_state.astype(jnp.float32)
    hs, ms = [], []
    for t in range(xs.shape[0]):
        gates = (
            jnp.dot(h.astype(cdt), params["wh_raw"], preferred_element_type=jnp.float32)
            + jnp.dot(xs[t].astype(cdt), params["wx_raw"], preferred_element_type=jnp.float32)
            + params["b_raw"]
        )
        i = jax.nn.sigmoid(gates[0 * H:1 * H])
        o = jax.nn.sigmoid(gates[1 * H:2 * H])
        c = jnp.tanh(gates[2 * H:3 * H])
        m = i * c
        h = o * jnp.tanh(m)
        hs.append(h)
        ms.append(m)
    return jnp.stack(hs), jnp.stack(ms)


if __name__ == "__main__":
    input_size, hidden_size, seq_len = 16, 32, 8

    key = jax.random.PRNGKey(0)
    k_params, k_x, k_h = jax.random.split(key, 3)

    params = make_params(k_params, input_size, hidden_size)
    xs = jax.random.normal(k_x, (seq_len, input_size), jnp.float32)
    h0 = jax.random.normal(k_h, (hidden_size,), jnp.float32)

    # Fused multi-timestep recurrence: hoisted x-path, chunked time axis,
    # lane-aligned gates, resident wh.
    hs, ms = jax.block_until_ready(mlstm_sequence_pallas(xs, h0, params))
    hs_ref, ms_ref = mlstm_sequence_ref(xs, h0, params)
    assert hs.shape == (seq_len, hidden_size) and ms.shape == (seq_len, hidden_size)
    assert jnp.allclose(hs, hs_ref, atol=1e-5, rtol=1e-5)
    assert jnp.allclose(ms, ms_ref, atol=1e-5, rtol=1e-5)

    # Single-step API parity with MLSTMCell.forward (memory_cell input ignored).
    h1, m1 = jax.block_until_ready(mlstm_cell_pallas(xs[0], h0, None, params))
    assert jnp.allclose(h1, hs_ref[0], atol=1e-5, rtol=1e-5)
    assert jnp.allclose(m1, ms_ref[0], atol=1e-5, rtol=1e-5)

    # None initial state path (module zero-fills).
    hz, mz = jax.block_until_ready(mlstm_sequence_pallas(xs, None, params))
    hz_ref, mz_ref = mlstm_sequence_ref(xs, None, params)
    assert jnp.allclose(hz, hz_ref, atol=1e-5, rtol=1e-5)
    assert jnp.allclose(mz, mz_ref, atol=1e-5, rtol=1e-5)

    # bf16 weight streaming (half the weight DMA bytes), f32 MXU accumulation
    # and f32 gate elementwise math (required on v5e: no bf16 VPU/EUP).
    params_bf16 = make_params(k_params, input_size, hidden_size,
                              param_dtype=jnp.bfloat16)
    hs_b, ms_b = jax.block_until_ready(mlstm_sequence_pallas(xs, h0, params_bf16))
    hs_br, ms_br = mlstm_sequence_ref(xs, h0, params_bf16)
    assert jnp.allclose(hs_b, hs_br, atol=5e-2, rtol=5e-2)
    assert jnp.allclose(ms_b, ms_br, atol=5e-2, rtol=5e-2)

    print("KERNEL_OK")
</pallas_src>

<mosaic_0001>
module attributes {stable_mosaic.version = 11 : i64} {
  func.func @_mlstm_chunk_kernel(%arg0: i32, %arg1: memref<8x384xf32, #tpu.memory_space<vmem>>, %arg2: memref<1x128xf32, #tpu.memory_space<vmem>>, %arg3: memref<128x384xf32, #tpu.memory_space<vmem>>, %arg4: memref<8x256xf32, #tpu.memory_space<vmem>>, %arg5: memref<1x128xf32, #tpu.memory_space<vmem>>) attributes {dimension_semantics = [#tpu.dimension_semantics<arbitrary>], iteration_bounds = array<i64: 1>, scalar_prefetch = 0 : i64, scratch_operands = 1 : i64, tpu.core_type = #tpu.core_type<tc>, window_params = [{transform_indices = @transform_0, window_bounds = array<i64: 8, 384>}, {pipeline_mode = #tpu.pipeline_mode<synchronous>, transform_indices = @transform_1, window_bounds = array<i64: 1, 128>}, {pipeline_mode = #tpu.pipeline_mode<synchronous>, transform_indices = @transform_2, window_bounds = array<i64: 128, 384>}, {transform_indices = @transform_3, window_bounds = array<i64: 8, 256>}]} {
    %c0_i32 = arith.constant 0 : i32
    %0 = arith.cmpi eq, %arg0, %c0_i32 : i32
    %1 = arith.extui %0 : i1 to i32
    %c0_i32_0 = arith.constant 0 : i32
    %2 = arith.cmpi ne, %1, %c0_i32_0 : i32
    scf.if %2 {
      %c0_53 = arith.constant 0 : index
      %c0_54 = arith.constant 0 : index
      %206 = vector.load %arg2[%c0_53, %c0_54] : memref<1x128xf32, #tpu.memory_space<vmem>>, vector<1x128xf32>
      %c0_55 = arith.constant 0 : index
      %c0_56 = arith.constant 0 : index
      %207 = vector.load %arg5[%c0_55, %c0_56] : memref<1x128xf32, #tpu.memory_space<vmem>>, vector<1x128xf32>
      tpu.vector_store %arg5[%c0_55, %c0_56], %206 {strides = array<i32>} : memref<1x128xf32, #tpu.memory_space<vmem>>, vector<1x128xf32>,
    } else {
    }
    %c0 = arith.constant 0 : index
    %c0_1 = arith.constant 0 : index
    %3 = vector.load %arg3[%c0, %c0_1] : memref<128x384xf32, #tpu.memory_space<vmem>>, vector<128x384xf32>
    %c0_2 = arith.constant 0 : index
    %c0_3 = arith.constant 0 : index
    %4 = vector.load %arg5[%c0_2, %c0_3] : memref<1x128xf32, #tpu.memory_space<vmem>>, vector<1x128xf32>
    %c0_i32_4 = arith.constant 0 : i32
    %cst = arith.constant dense<0.000000e+00> : vector<1x384xf32>
    %5 = tpu.matmul %4, %3, %cst {dimension_numbers = #tpu.dot_dimension_numbers<[1], [0], [0], [1], [0, 0, 1, 1], [], []>} : vector<1x128xf32>, vector<128x384xf32>, vector<1x384xf32> -> vector<1x384xf32>
    %6 = arith.index_cast %c0_i32_4 : i32 to index
    %c0_5 = arith.constant 0 : index
    %7 = vector.load %arg1[%6, %c0_5] : memref<8x384xf32, #tpu.memory_space<vmem>>, vector<1x384xf32>
    %8 = arith.addf %5, %7 : vector<1x384xf32>
    %9 = vector.extract_strided_slice %8 {offsets = [0, 0], sizes = [1, 128], strides = [1, 1]} : vector<1x384xf32> to vector<1x128xf32>
    %10 = arith.negf %9 : vector<1x128xf32>
    %11 = math.exp %10 : vector<1x128xf32>
    %cst_6 = arith.constant 1.000000e+00 : f32
    %12 = vector.broadcast %cst_6 : f32 to vector<1x128xf32>
    %13 = arith.addf %12, %11 : vector<1x128xf32>
    %14 = arith.divf %12, %13 : vector<1x128xf32>
    %15 = vector.extract_strided_slice %8 {offsets = [0, 128], sizes = [1, 128], strides = [1, 1]} : vector<1x384xf32> to vector<1x128xf32>
    %16 = arith.negf %15 : vector<1x128xf32>
    %17 = math.exp %16 : vector<1x128xf32>
    %cst_7 = arith.constant 1.000000e+00 : f32
    %18 = vector.broadcast %cst_7 : f32 to vector<1x128xf32>
    %19 = arith.addf %18, %17 : vector<1x128xf32>
    %20 = arith.divf %18, %19 : vector<1x128xf32>
    %21 = vector.extract_strided_slice %8 {offsets = [0, 256], sizes = [1, 128], strides = [1, 1]} : vector<1x384xf32> to vector<1x128xf32>
    %22 = math.tanh %21 : vector<1x128xf32>
    %23 = arith.mulf %14, %22 : vector<1x128xf32>
    %24 = math.tanh %23 : vector<1x128xf32>
    %25 = arith.mulf %20, %24 : vector<1x128xf32>
    %26 = arith.index_cast %c0_i32_4 : i32 to index
    %c0_8 = arith.constant 0 : index
    %27 = vector.load %arg4[%26, %c0_8] : memref<8x256xf32, #tpu.memory_space<vmem>>, vector<1x128xf32>
    tpu.vector_store %arg4[%26, %c0_8], %25 {strides = array<i32>} : memref<8x256xf32, #tpu.memory_space<vmem>>, vector<1x128xf32>,
    %28 = arith.index_cast %c0_i32_4 : i32 to index
    %c128 = arith.constant 128 : index
    %29 = vector.load %arg4[%28, %c128] : memref<8x256xf32, #tpu.memory_space<vmem>>, vector<1x128xf32>
    tpu.vector_store %arg4[%28, %c128], %23 {strides = array<i32>} : memref<8x256xf32, #tpu.memory_space<vmem>>, vector<1x128xf32>,
    %c1_i32 = arith.constant 1 : i32
    %cst_9 = arith.constant dense<0.000000e+00> : vector<1x384xf32>
    %30 = tpu.matmul %25, %3, %cst_9 {dimension_numbers = #tpu.dot_dimension_numbers<[1], [0], [0], [1], [0, 0, 1, 1], [], []>} : vector<1x128xf32>, vector<128x384xf32>, vector<1x384xf32> -> vector<1x384xf32>
    %31 = arith.index_cast %c1_i32 : i32 to index
    %c0_10 = arith.constant 0 : index
    %32 = vector.load %arg1[%31, %c0_10] : memref<8x384xf32, #tpu.memory_space<vmem>>, vector<1x384xf32>
    %33 = arith.addf %30, %32 : vector<1x384xf32>
    %34 = vector.extract_strided_slice %33 {offsets = [0, 0], sizes = [1, 128], strides = [1, 1]} : vector<1x384xf32> to vector<1x128xf32>
    %35 = arith.negf %34 : vector<1x128xf32>
    %36 = math.exp %35 : vector<1x128xf32>
    %cst_11 = arith.constant 1.000000e+00 : f32
    %37 = vector.broadcast %cst_11 : f32 to vector<1x128xf32>
    %38 = arith.addf %37, %36 : vector<1x128xf32>
    %39 = arith.divf %37, %38 : vector<1x128xf32>
    %40 = vector.extract_strided_slice %33 {offsets = [0, 128], sizes = [1, 128], strides = [1, 1]} : vector<1x384xf32> to vector<1x128xf32>
    %41 = arith.negf %40 : vector<1x128xf32>
    %42 = math.exp %41 : vector<1x128xf32>
    %cst_12 = arith.constant 1.000000e+00 : f32
    %43 = vector.broadcast %cst_12 : f32 to vector<1x128xf32>
    %44 = arith.addf %43, %42 : vector<1x128xf32>
    %45 = arith.divf %43, %44 : vector<1x128xf32>
    %46 = vector.extract_strided_slice %33 {offsets = [0, 256], sizes = [1, 128], strides = [1, 1]} : vector<1x384xf32> to vector<1x128xf32>
    %47 = math.tanh %46 : vector<1x128xf32>
    %48 = arith.mulf %39, %47 : vector<1x128xf32>
    %49 = math.tanh %48 : vector<1x128xf32>
    %50 = arith.mulf %45, %49 : vector<1x128xf32>
    %51 = arith.index_cast %c1_i32 : i32 to index
    %c0_13 = arith.constant 0 : index
    %52 = vector.load %arg4[%51, %c0_13] : memref<8x256xf32, #tpu.memory_space<vmem>>, vector<1x128xf32>
    tpu.vector_store %arg4[%51, %c0_13], %50 {strides = array<i32>} : memref<8x256xf32, #tpu.memory_space<vmem>>, vector<1x128xf32>,
    %53 = arith.index_cast %c1_i32 : i32 to index
    %c128_14 = arith.constant 128 : index
    %54 = vector.load %arg4[%53, %c128_14] : memref<8x256xf32, #tpu.memory_space<vmem>>, vector<1x128xf32>
    tpu.vector_store %arg4[%53, %c128_14], %48 {strides = array<i32>} : memref<8x256xf32, #tpu.memory_space<vmem>>, vector<1x128xf32>,
    %c2_i32 = arith.constant 2 : i32
    %cst_15 = arith.constant dense<0.000000e+00> : vector<1x384xf32>
    %55 = tpu.matmul %50, %3, %cst_15 {dimension_numbers = #tpu.dot_dimension_numbers<[1], [0], [0], [1], [0, 0, 1, 1], [], []>} : vector<1x128xf32>, vector<128x384xf32>, vector<1x384xf32> -> vector<1x384xf32>
    %56 = arith.index_cast %c2_i32 : i32 to index
    %c0_16 = arith.constant 0 : index
    %57 = vector.load %arg1[%56, %c0_16] : memref<8x384xf32, #tpu.memory_space<vmem>>, vector<1x384xf32>
    %58 = arith.addf %55, %57 : vector<1x384xf32>
    %59 = vector.extract_strided_slice %58 {offsets = [0, 0], sizes = [1, 128], strides = [1, 1]} : vector<1x384xf32> to vector<1x128xf32>
    %60 = arith.negf %59 : vector<1x128xf32>
    %61 = math.exp %60 : vector<1x128xf32>
    %cst_17 = arith.constant 1.000000e+00 : f32
    %62 = vector.broadcast %cst_17 : f32 to vector<1x128xf32>
    %63 = arith.addf %62, %61 : vector<1x128xf32>
    %64 = arith.divf %62, %63 : vector<1x128xf32>
    %65 = vector.extract_strided_slice %58 {offsets = [0, 128], sizes = [1, 128], strides = [1, 1]} : vector<1x384xf32> to vector<1x128xf32>
    %66 = arith.negf %65 : vector<1x128xf32>
    %67 = math.exp %66 : vector<1x128xf32>
    %cst_18 = arith.constant 1.000000e+00 : f32
    %68 = vector.broadcast %cst_18 : f32 to vector<1x128xf32>
    %69 = arith.addf %68, %67 : vector<1x128xf32>
    %70 = arith.divf %68, %69 : vector<1x128xf32>
    %71 = vector.extract_strided_slice %58 {offsets = [0, 256], sizes = [1, 128], strides = [1, 1]} : vector<1x384xf32> to vector<1x128xf32>
    %72 = math.tanh %71 : vector<1x128xf32>
    %73 = arith.mulf %64, %72 : vector<1x128xf32>
    %74 = math.tanh %73 : vector<1x128xf32>
    %75 = arith.mulf %70, %74 : vector<1x128xf32>
    %76 = arith.index_cast %c2_i32 : i32 to index
    %c0_19 = arith.constant 0 : index
    %77 = vector.load %arg4[%76, %c0_19] : memref<8x256xf32, #tpu.memory_space<vmem>>, vector<1x128xf32>
    tpu.vector_store %arg4[%76, %c0_19], %75 {strides = array<i32>} : memref<8x256xf32, #tpu.memory_space<vmem>>, vector<1x128xf32>,
    %78 = arith.index_cast %c2_i32 : i32 to index
    %c128_20 = arith.constant 128 : index
    %79 = vector.load %arg4[%78, %c128_20] : memref<8x256xf32, #tpu.memory_space<vmem>>, vector<1x128xf32>
    tpu.vector_store %arg4[%78, %c128_20], %73 {strides = array<i32>} : memref<8x256xf32, #tpu.memory_space<vmem>>, vector<1x128xf32>,
    %c3_i32 = arith.constant 3 : i32
    %cst_21 = arith.constant dense<0.000000e+00> : vector<1x384xf32>
    %80 = tpu.matmul %75, %3, %cst_21 {dimension_numbers = #tpu.dot_dimension_numbers<[1], [0], [0], [1], [0, 0, 1, 1], [], []>} : vector<1x128xf32>, vector<128x384xf32>, vector<1x384xf32> -> vector<1x384xf32>
    %81 = arith.index_cast %c3_i32 : i32 to index
    %c0_22 = arith.constant 0 : index
    %82 = vector.load %arg1[%81, %c0_22] : memref<8x384xf32, #tpu.memory_space<vmem>>, vector<1x384xf32>
    %83 = arith.addf %80, %82 : vector<1x384xf32>
    %84 = vector.extract_strided_slice %83 {offsets = [0, 0], sizes = [1, 128], strides = [1, 1]} : vector<1x384xf32> to vector<1x128xf32>
    %85 = arith.negf %84 : vector<1x128xf32>
    %86 = math.exp %85 : vector<1x128xf32>
    %cst_23 = arith.constant 1.000000e+00 : f32
    %87 = vector.broadcast %cst_23 : f32 to vector<1x128xf32>
    %88 = arith.addf %87, %86 : vector<1x128xf32>
    %89 = arith.divf %87, %88 : vector<1x128xf32>
    %90 = vector.extract_strided_slice %83 {offsets = [0, 128], sizes = [1, 128], strides = [1, 1]} : vector<1x384xf32> to vector<1x128xf32>
    %91 = arith.negf %90 : vector<1x128xf32>
    %92 = math.exp %91 : vector<1x128xf32>
    %cst_24 = arith.constant 1.000000e+00 : f32
    %93 = vector.broadcast %cst_24 : f32 to vector<1x128xf32>
    %94 = arith.addf %93, %92 : vector<1x128xf32>
    %95 = arith.divf %93, %94 : vector<1x128xf32>
    %96 = vector.extract_strided_slice %83 {offsets = [0, 256], sizes = [1, 128], strides = [1, 1]} : vector<1x384xf32> to vector<1x128xf32>
    %97 = math.tanh %96 : vector<1x128xf32>
    %98 = arith.mulf %89, %97 : vector<1x128xf32>
    %99 = math.tanh %98 : vector<1x128xf32>
    %100 = arith.mulf %95, %99 : vector<1x128xf32>
    %101 = arith.index_cast %c3_i32 : i32 to index
    %c0_25 = arith.constant 0 : index
    %102 = vector.load %arg4[%101, %c0_25] : memref<8x256xf32, #tpu.memory_space<vmem>>, vector<1x128xf32>
    tpu.vector_store %arg4[%101, %c0_25], %100 {strides = array<i32>} : memref<8x256xf32, #tpu.memory_space<vmem>>, vector<1x128xf32>,
    %103 = arith.index_cast %c3_i32 : i32 to index
    %c128_26 = arith.constant 128 : index
    %104 = vector.load %arg4[%103, %c128_26] : memref<8x256xf32, #tpu.memory_space<vmem>>, vector<1x128xf32>
    tpu.vector_store %arg4[%103, %c128_26], %98 {strides = array<i32>} : memref<8x256xf32, #tpu.memory_space<vmem>>, vector<1x128xf32>,
    %c4_i32 = arith.constant 4 : i32
    %cst_27 = arith.constant dense<0.000000e+00> : vector<1x384xf32>
    %105 = tpu.matmul %100, %3, %cst_27 {dimension_numbers = #tpu.dot_dimension_numbers<[1], [0], [0], [1], [0, 0, 1, 1], [], []>} : vector<1x128xf32>, vector<128x384xf32>, vector<1x384xf32> -> vector<1x384xf32>
    %106 = arith.index_cast %c4_i32 : i32 to index
    %c0_28 = arith.constant 0 : index
    %107 = vector.load %arg1[%106, %c0_28] : memref<8x384xf32, #tpu.memory_space<vmem>>, vector<1x384xf32>
    %108 = arith.addf %105, %107 : vector<1x384xf32>
    %109 = vector.extract_strided_slice %108 {offsets = [0, 0], sizes = [1, 128], strides = [1, 1]} : vector<1x384xf32> to vector<1x128xf32>
    %110 = arith.negf %109 : vector<1x128xf32>
    %111 = math.exp %110 : vector<1x128xf32>
    %cst_29 = arith.constant 1.000000e+00 : f32
    %112 = vector.broadcast %cst_29 : f32 to vector<1x128xf32>
    %113 = arith.addf %112, %111 : vector<1x128xf32>
    %114 = arith.divf %112, %113 : vector<1x128xf32>
    %115 = vector.extract_strided_slice %108 {offsets = [0, 128], sizes = [1, 128], strides = [1, 1]} : vector<1x384xf32> to vector<1x128xf32>
    %116 = arith.negf %115 : vector<1x128xf32>
    %117 = math.exp %116 : vector<1x128xf32>
    %cst_30 = arith.constant 1.000000e+00 : f32
    %118 = vector.broadcast %cst_30 : f32 to vector<1x128xf32>
    %119 = arith.addf %118, %117 : vector<1x128xf32>
    %120 = arith.divf %118, %119 : vector<1x128xf32>
    %121 = vector.extract_strided_slice %108 {offsets = [0, 256], sizes = [1, 128], strides = [1, 1]} : vector<1x384xf32> to vector<1x128xf32>
    %122 = math.tanh %121 : vector<1x128xf32>
    %123 = arith.mulf %114, %122 : vector<1x128xf32>
    %124 = math.tanh %123 : vector<1x128xf32>
    %125 = arith.mulf %120, %124 : vector<1x128xf32>
    %126 = arith.index_cast %c4_i32 : i32 to index
    %c0_31 = arith.constant 0 : index
    %127 = vector.load %arg4[%126, %c0_31] : memref<8x256xf32, #tpu.memory_space<vmem>>, vector<1x128xf32>
    tpu.vector_store %arg4[%126, %c0_31], %125 {strides = array<i32>} : memref<8x256xf32, #tpu.memory_space<vmem>>, vector<1x128xf32>,
    %128 = arith.index_cast %c4_i32 : i32 to index
    %c128_32 = arith.constant 128 : index
    %129 = vector.load %arg4[%128, %c128_32] : memref<8x256xf32, #tpu.memory_space<vmem>>, vector<1x128xf32>
    tpu.vector_store %arg4[%128, %c128_32], %123 {strides = array<i32>} : memref<8x256xf32, #tpu.memory_space<vmem>>, vector<1x128xf32>,
    %c5_i32 = arith.constant 5 : i32
    %cst_33 = arith.constant dense<0.000000e+00> : vector<1x384xf32>
    %130 = tpu.matmul %125, %3, %cst_33 {dimension_numbers = #tpu.dot_dimension_numbers<[1], [0], [0], [1], [0, 0, 1, 1], [], []>} : vector<1x128xf32>, vector<128x384xf32>, vector<1x384xf32> -> vector<1x384xf32>
    %131 = arith.index_cast %c5_i32 : i32 to index
    %c0_34 = arith.constant 0 : index
    %132 = vector.load %arg1[%131, %c0_34] : memref<8x384xf32, #tpu.memory_space<vmem>>, vector<1x384xf32>
    %133 = arith.addf %130, %132 : vector<1x384xf32>
    %134 = vector.extract_strided_slice %133 {offsets = [0, 0], sizes = [1, 128], strides = [1, 1]} : vector<1x384xf32> to vector<1x128xf32>
    %135 = arith.negf %134 : vector<1x128xf32>
    %136 = math.exp %135 : vector<1x128xf32>
    %cst_35 = arith.constant 1.000000e+00 : f32
    %137 = vector.broadcast %cst_35 : f32 to vector<1x128xf32>
    %138 = arith.addf %137, %136 : vector<1x128xf32>
    %139 = arith.divf %137, %138 : vector<1x128xf32>
    %140 = vector.extract_strided_slice %133 {offsets = [0, 128], sizes = [1, 128], strides = [1, 1]} : vector<1x384xf32> to vector<1x128xf32>
    %141 = arith.negf %140 : vector<1x128xf32>
    %142 = math.exp %141 : vector<1x128xf32>
    %cst_36 = arith.constant 1.000000e+00 : f32
    %143 = vector.broadcast %cst_36 : f32 to vector<1x128xf32>
    %144 = arith.addf %143, %142 : vector<1x128xf32>
    %145 = arith.divf %143, %144 : vector<1x128xf32>
    %146 = vector.extract_strided_slice %133 {offsets = [0, 256], sizes = [1, 128], strides = [1, 1]} : vector<1x384xf32> to vector<1x128xf32>
    %147 = math.tanh %146 : vector<1x128xf32>
    %148 = arith.mulf %139, %147 : vector<1x128xf32>
    %149 = math.tanh %148 : vector<1x128xf32>
    %150 = arith.mulf %145, %149 : vector<1x128xf32>
    %151 = arith.index_cast %c5_i32 : i32 to index
    %c0_37 = arith.constant 0 : index
    %152 = vector.load %arg4[%151, %c0_37] : memref<8x256xf32, #tpu.memory_space<vmem>>, vector<1x128xf32>
    tpu.vector_store %arg4[%151, %c0_37], %150 {strides = array<i32>} : memref<8x256xf32, #tpu.memory_space<vmem>>, vector<1x128xf32>,
    %153 = arith.index_cast %c5_i32 : i32 to index
    %c128_38 = arith.constant 128 : index
    %154 = vector.load %arg4[%153, %c128_38] : memref<8x256xf32, #tpu.memory_space<vmem>>, vector<1x128xf32>
    tpu.vector_store %arg4[%153, %c128_38], %148 {strides = array<i32>} : memref<8x256xf32, #tpu.memory_space<vmem>>, vector<1x128xf32>,
    %c6_i32 = arith.constant 6 : i32
    %cst_39 = arith.constant dense<0.000000e+00> : vector<1x384xf32>
    %155 = tpu.matmul %150, %3, %cst_39 {dimension_numbers = #tpu.dot_dimension_numbers<[1], [0], [0], [1], [0, 0, 1, 1], [], []>} : vector<1x128xf32>, vector<128x384xf32>, vector<1x384xf32> -> vector<1x384xf32>
    %156 = arith.index_cast %c6_i32 : i32 to index
    %c0_40 = arith.constant 0 : index
    %157 = vector.load %arg1[%156, %c0_40] : memref<8x384xf32, #tpu.memory_space<vmem>>, vector<1x384xf32>
    %158 = arith.addf %155, %157 : vector<1x384xf32>
    %159 = vector.extract_strided_slice %158 {offsets = [0, 0], sizes = [1, 128], strides = [1, 1]} : vector<1x384xf32> to vector<1x128xf32>
    %160 = arith.negf %159 : vector<1x128xf32>
    %161 = math.exp %160 : vector<1x128xf32>
    %cst_41 = arith.constant 1.000000e+00 : f32
    %162 = vector.broadcast %cst_41 : f32 to vector<1x128xf32>
    %163 = arith.addf %162, %161 : vector<1x128xf32>
    %164 = arith.divf %162, %163 : vector<1x128xf32>
    %165 = vector.extract_strided_slice %158 {offsets = [0, 128], sizes = [1, 128], strides = [1, 1]} : vector<1x384xf32> to vector<1x128xf32>
    %166 = arith.negf %165 : vector<1x128xf32>
    %167 = math.exp %166 : vector<1x128xf32>
    %cst_42 = arith.constant 1.000000e+00 : f32
    %168 = vector.broadcast %cst_42 : f32 to vector<1x128xf32>
    %169 = arith.addf %168, %167 : vector<1x128xf32>
    %170 = arith.divf %168, %169 : vector<1x128xf32>
    %171 = vector.extract_strided_slice %158 {offsets = [0, 256], sizes = [1, 128], strides = [1, 1]} : vector<1x384xf32> to vector<1x128xf32>
    %172 = math.tanh %171 : vector<1x128xf32>
    %173 = arith.mulf %164, %172 : vector<1x128xf32>
    %174 = math.tanh %173 : vector<1x128xf32>
    %175 = arith.mulf %170, %174 : vector<1x128xf32>
    %176 = arith.index_cast %c6_i32 : i32 to index
    %c0_43 = arith.constant 0 : index
    %177 = vector.load %arg4[%176, %c0_43] : memref<8x256xf32, #tpu.memory_space<vmem>>, vector<1x128xf32>
    tpu.vector_store %arg4[%176, %c0_43], %175 {strides = array<i32>} : memref<8x256xf32, #tpu.memory_space<vmem>>, vector<1x128xf32>,
    %178 = arith.index_cast %c6_i32 : i32 to index
    %c128_44 = arith.constant 128 : index
    %179 = vector.load %arg4[%178, %c128_44] : memref<8x256xf32, #tpu.memory_space<vmem>>, vector<1x128xf32>
    tpu.vector_store %arg4[%178, %c128_44], %173 {strides = array<i32>} : memref<8x256xf32, #tpu.memory_space<vmem>>, vector<1x128xf32>,
    %c7_i32 = arith.constant 7 : i32
    %cst_45 = arith.constant dense<0.000000e+00> : vector<1x384xf32>
    %180 = tpu.matmul %175, %3, %cst_45 {dimension_numbers = #tpu.dot_dimension_numbers<[1], [0], [0], [1], [0, 0, 1, 1], [], []>} : vector<1x128xf32>, vector<128x384xf32>, vector<1x384xf32> -> vector<1x384xf32>
    %181 = arith.index_cast %c7_i32 : i32 to index
    %c0_46 = arith.constant 0 : index
    %182 = vector.load %arg1[%181, %c0_46] : memref<8x384xf32, #tpu.memory_space<vmem>>, vector<1x384xf32>
    %183 = arith.addf %180, %182 : vector<1x384xf32>
    %184 = vector.extract_strided_slice %183 {offsets = [0, 0], sizes = [1, 128], strides = [1, 1]} : vector<1x384xf32> to vector<1x128xf32>
    %185 = arith.negf %184 : vector<1x128xf32>
    %186 = math.exp %185 : vector<1x128xf32>
    %cst_47 = arith.constant 1.000000e+00 : f32
    %187 = vector.broadcast %cst_47 : f32 to vector<1x128xf32>
    %188 = arith.addf %187, %186 : vector<1x128xf32>
    %189 = arith.divf %187, %188 : vector<1x128xf32>
    %190 = vector.extract_strided_slice %183 {offsets = [0, 128], sizes = [1, 128], strides = [1, 1]} : vector<1x384xf32> to vector<1x128xf32>
    %191 = arith.negf %190 : vector<1x128xf32>
    %192 = math.exp %191 : vector<1x128xf32>
    %cst_48 = arith.constant 1.000000e+00 : f32
    %193 = vector.broadcast %cst_48 : f32 to vector<1x128xf32>
    %194 = arith.addf %193, %192 : vector<1x128xf32>
    %195 = arith.divf %193, %194 : vector<1x128xf32>
    %196 = vector.extract_strided_slice %183 {offsets = [0, 256], sizes = [1, 128], strides = [1, 1]} : vector<1x384xf32> to vector<1x128xf32>
    %197 = math.tanh %196 : vector<1x128xf32>
    %198 = arith.mulf %189, %197 : vector<1x128xf32>
    %199 = math.tanh %198 : vector<1x128xf32>
    %200 = arith.mulf %195, %199 : vector<1x128xf32>
    %201 = arith.index_cast %c7_i32 : i32 to index
    %c0_49 = arith.constant 0 : index
    %202 = vector.load %arg4[%201, %c0_49] : memref<8x256xf32, #tpu.memory_space<vmem>>, vector<1x128xf32>
    tpu.vector_store %arg4[%201, %c0_49], %200 {strides = array<i32>} : memref<8x256xf32, #tpu.memory_space<vmem>>, vector<1x128xf32>,
    %203 = arith.index_cast %c7_i32 : i32 to index
    %c128_50 = arith.constant 128 : index
    %204 = vector.load %arg4[%203, %c128_50] : memref<8x256xf32, #tpu.memory_space<vmem>>, vector<1x128xf32>
    tpu.vector_store %arg4[%203, %c128_50], %198 {strides = array<i32>} : memref<8x256xf32, #tpu.memory_space<vmem>>, vector<1x128xf32>,
    %c8_i32 = arith.constant 8 : i32
    %c0_51 = arith.constant 0 : index
    %c0_52 = arith.constant 0 : index
    %205 = vector.load %arg5[%c0_51, %c0_52] : memref<1x128xf32, #tpu.memory_space<vmem>>, vector<1x128xf32>
    tpu.vector_store %arg5[%c0_51, %c0_52], %200 {strides = array<i32>} : memref<1x128xf32, #tpu.memory_space<vmem>>, vector<1x128xf32>,
    return
  }
  func.func @transform_0(%arg0: i32) -> (i32, i32) {
    %c0_i32 = arith.constant 0 : i32
    %c0_i32_0 = arith.constant 0 : i32
    return %arg0, %c0_i32 : i32, i32
  }
  func.func @transform_1(%arg0: i32) -> (i32, i32) {
    %c0_i32 = arith.constant 0 : i32
    %c0_i32_0 = arith.constant 0 : i32
    %c0_i32_1 = arith.constant 0 : i32
    return %c0_i32, %c0_i32_0 : i32, i32
  }
  func.func @transform_2(%arg0: i32) -> (i32, i32) {
    %c0_i32 = arith.constant 0 : i32
    %c0_i32_0 = arith.constant 0 : i32
    %c0_i32_1 = arith.constant 0 : i32
    return %c0_i32, %c0_i32_0 : i32, i32
  }
  func.func @transform_3(%arg0: i32) -> (i32, i32) {
    %c0_i32 = arith.constant 0 : i32
    %c0_i32_0 = arith.constant 0 : i32
    return %arg0, %c0_i32 : i32, i32
  }
}

</mosaic_0001>

<bundles_post_ra>
// kernel: tpu_custom_call.1
= control target key start
LH: loop header
LB: loop body
LE: loop exit
PB: predicated region body
PF: predicated region fallthrough
CT: control target
= control target key end

     0   :  { %8 = vsyncpa [#allocation4], 0  ;;  %s1821_s0 = inlined_call_operand.hbm [shape: f32[8,384], index: 0, kind: input, shape index: {}]   ;;  %s1822_s1 = inlined_call_operand.hbm [shape: f32[1,128], index: 1, kind: input, shape index: {}]   ;;  %s1823_s2 = inlined_call_operand.hbm [shape: f32[128,384], index: 2, kind: input, shape index: {}]   ;;  %s1824_s3 = inlined_call_operand.hbm [shape: f32[8,256], index: 3, kind: output, shape index: {}]  }
   0x1   :  { %9 = vsyncpa [#allocation7], 0  ;;  %s27_s14 = sshll.u32 %s1822_s1, 4  ;;  %s28_s14 = int_to_ptr.hbm [resolvable:$true] %s27_s14 }
   0x2   :  { %10 = vsyncpa [#allocation5], 0  ;;  %s1303_s15 = smov [#allocation6]   ;;  %s16_s19 = sshll.u32 %s1821_s0, 4  ;;  %s17_s19 = int_to_ptr.hbm [resolvable:$true] %s16_s19 }
   0x3   :  { %s29_s16 = sshll.u32 %s1303_s15, 4  ;;  %s1304_s20 = smov [#allocation3]   ;;  %s30_s16 = int_to_ptr.vmem [resolvable:$true] %s29_s16 }
   0x4   :  { %32 = dma.hbm_to_vmem [thread:$0]  %s28_s14, 16, %s30_s16, [#allocation7]  }
   0x5   :  { %s18_s21 = sshll.u32 %s1304_s20, 4  ;;  %s37_s24 = sshll.u32 %s1823_s2, 4  ;;  %s19_s21 = int_to_ptr.vmem [resolvable:$true] %s18_s21  ;;  %s38_s24 = int_to_ptr.hbm [resolvable:$true] %s37_s24 }
   0x6   :  { %21 = dma.hbm_to_vmem [thread:$0]  %s17_s19, 384, %s19_s21, [#allocation4]  }
   0x7   :  { %s1305_s1 = smov [#allocation8]   ;;  %s1306_s26 = smov 384  }
   0x8   :  { %s39_s25 = sshll.u32 %s1305_s1, 4  ;;  %s1307_s27 = smov 24   ;;  %s40_s25 = int_to_ptr.vmem [resolvable:$true] %s39_s25 }
   0x9   :  { %45 = dma.hbm_to_vmem [thread:$0]  %s38_s24, 6144, %s40_s25, [#allocation7], %s1306_s26, %s1306_s26, %s1307_s27  }
   0xa   :  { %1297 = dma.done.wait [#allocation4], 384  }
   0xb   :  { %1298 = vsyncadd [#allocation4], 4294966912 }
   0xc   :  { %1299 = dma.done.wait [#allocation7], 6160  }
   0xd   :  { %1300 = vsyncadd [#allocation7], 4294961136  ;;  %v1338_v0 = vld [vmem:[#allocation8 + $0x168] sm:$0xff]  ;;  %v1340_v1 = vld [vmem:[#allocation8 + $0x170] sm:$0xff]  ;;  %s1308_s0 = smov [#allocation9]   ;;  %s1024_s30 = sshll.u32 %s1824_s3, 4  ;;  %s1025_s30 = int_to_ptr.hbm [resolvable:$true] %s1024_s30 }
   0xe   :  { %v1342_v2 = vld [vmem:[#allocation8 + $0x150] sm:$0xff]  ;;  %121 = vmatpush.msra.mxu0 %v1338_v0  ;;  %141 = vmatpush.msra.mxu1 %v1340_v1  ;;  %v1346_v3 = vld [vmem:[#allocation8 + $0x158] sm:$0xff]  ;;  %v1350_v5 = vld [vmem:[#allocation8 + $0x140] sm:$0xff]  ;;  %s1022_s2 = sshll.u32 %s1308_s0, 4  ;;  %s1023_s2 = int_to_ptr.vmem [resolvable:$true] %s1022_s2 }
   0xf   :  { %v1348_v4 = vld [vmem:[#allocation8 + $0x138] sm:$0xff]  ;;  %234 = vmatpush.msra.mxu3 %v1338_v0  ;;  %v1355_v6 = vld [vmem:[#allocation8 + $0x120] sm:$0xff]  ;;  %v1357_v7 = vld [vmem:[#allocation8 + $0x128] sm:$0xff] }
  0x10   :  { %122 = vmatpush.msra.mxu0 %v1342_v2  ;;  %142 = vmatpush.msra.mxu1 %v1346_v3  ;;  %v1362_v8 = vld [vmem:[#allocation8 + $0x178] sm:$0xff]  ;;  %v1364_v9 = vld [vmem:[#allocation8 + $0x108] sm:$0xff]  ;;  %v1366_v10 = vld [vmem:[#allocation8 + $0x110] sm:$0xff] }
  0x11   :  { %235 = vmatpush.msra.mxu3 %v1342_v2  ;;  %161 = vmatpush.msra.mxu2 %v1362_v8  ;;  %v1369_v11 = vld [vmem:[#allocation8 + $0x160] sm:$0xff]  ;;  %v1374_v12 = vld [vmem:[#allocation8 + $0x148] sm:$0xff]  ;;  %v1376_v13 = vld [vmem:[#allocation8 + $0xf0] sm:$0xff] }
  0x12   :  { %123 = vmatpush.msra.mxu0 %v1348_v4  ;;  %143 = vmatpush.msra.mxu1 %v1350_v5  ;;  %v1378_v14 = vld [vmem:[#allocation8 + $0xf8] sm:$0xff]  ;;  %v1384_v15 = vld [vmem:[#allocation8 + $0x130] sm:$0xff]  ;;  %v1388_v17 = vld [vmem:[#allocation8 + $0xe0] sm:$0xff] }
  0x13   :  { %236 = vmatpush.msra.mxu3 %v1348_v4  ;;  %162 = vmatpush.msra.mxu2 %v1369_v11  ;;  %v1386_v16 = vld [vmem:[#allocation8 + $0xd8] sm:$0xff]  ;;  %v1396_v19 = vld [vmem:[#allocation8 + $0xc0] sm:$0xff]  ;;  %v1398_v20 = vld [vmem:[#allocation8 + $0xc8] sm:$0xff] }
  0x14   :  { %124 = vmatpush.msra.mxu0 %v1355_v6  ;;  %144 = vmatpush.msra.mxu1 %v1357_v7  ;;  %v1394_v18 = vld [vmem:[#allocation8 + $0x118] sm:$0xff]  ;;  %v1404_v21 = vld [vmem:[#allocation8 + $0x100] sm:$0xff]  ;;  %v1406_v23 = vld [vmem:[#allocation8 + $0xa8] sm:$0xff] }
  0x15   :  { %237 = vmatpush.msra.mxu3 %v1355_v6  ;;  %163 = vmatpush.msra.mxu2 %v1374_v12  ;;  %v62_v22 = vld [vmem:[#allocation6] sm:$0x1]  ;;  %v1408_v24 = vld [vmem:[#allocation8 + $0xb0] sm:$0xff]  ;;  %v1414_v25 = vld [vmem:[#allocation8 + $0xe8] sm:$0xff] }
  0x16   :  { %125 = vmatpush.msra.mxu0 %v1364_v9  ;;  %145 = vmatpush.msra.mxu1 %v1366_v10  ;;  %63 = vst [vmem:[#allocation2] sm:$0x1] %v62_v22  ;;  %v1416_v26 = vld [vmem:[#allocation8 + $0x90] sm:$0xff]  ;;  %v1418_v27 = vld [vmem:[#allocation8 + $0x98] sm:$0xff]  ;;  %v1428_v30 = vld [vmem:[#allocation8 + $0x80] sm:$0xff] }
  0x17   :  { %238 = vmatpush.msra.mxu3 %v1364_v9  ;;  %164 = vmatpush.msra.mxu2 %v1384_v15  ;;  %v1424_v28 = vld [vmem:[#allocation8 + $0xd0] sm:$0xff]  ;;  %v1426_v29 = vld [vmem:[#allocation8 + $0x78] sm:$0xff]  ;;  %v1436_v32 = vld [vmem:[#allocation8 + $0x60] sm:$0xff] }
  0x18   :  { %126 = vmatpush.msra.mxu0 %v1376_v13  ;;  %146 = vmatpush.msra.mxu1 %v1378_v14  ;;  %v1434_v31 = vld [vmem:[#allocation8 + $0xb8] sm:$0xff]  ;;  %v1438_v33 = vld [vmem:[#allocation8 + $0x68] sm:$0xff]  ;;  %v1444_v34 = vld [vmem:[#allocation8 + $0xa0] sm:$0xff] }
  0x19   :  { %239 = vmatpush.msra.mxu3 %v1376_v13  ;;  %165 = vmatpush.msra.mxu2 %v1394_v18  ;;  %v1446_v35 = vld [vmem:[#allocation8 + $0x48] sm:$0xff]  ;;  %v1448_v36 = vld [vmem:[#allocation8 + $0x50] sm:$0xff]  ;;  %v1458_v39 = vld [vmem:[#allocation8 + $0x38] sm:$0xff] }
  0x1a   :  { %127 = vmatpush.msra.mxu0 %v1386_v16  ;;  %147 = vmatpush.msra.mxu1 %v1388_v17  ;;  %v1454_v37 = vld [vmem:[#allocation8 + $0x88] sm:$0xff]  ;;  %v1456_v38 = vld [vmem:[#allocation8 + $0x30] sm:$0xff]  ;;  %v1466_v41 = vld [vmem:[#allocation8 + $0x18] sm:$0xff] }
  0x1b   :  { %240 = vmatpush.msra.mxu3 %v1386_v16  ;;  %166 = vmatpush.msra.mxu2 %v1404_v21  ;;  %v1464_v40 = vld [vmem:[#allocation8 + $0x70] sm:$0xff]  ;;  %1837 = vst [vmem:[#allocation13_spill] sm:$0xff] %v1466_v41  ;;  %v1468_v42 = vld [vmem:[#allocation8 + $0x20] sm:$0xff]  ;;  %v1474_v43 = vld [vmem:[#allocation8 + $0x58] sm:$0xff] }
  0x1c   :  { %128 = vmatpush.msra.mxu0 %v1396_v19  ;;  %148 = vmatpush.msra.mxu1 %v1398_v20  ;;  %1838 = vst [vmem:[#allocation14_spill] sm:$0xff] %v1468_v42  ;;  %v1476_v44 = vld [vmem:[#allocation8] sm:$0xff]  ;;  %v1478_v45 = vld [vmem:[#allocation8 + $0x8] sm:$0xff]  ;;  %v1494_v49 = vld [vmem:[#allocation8 + $0x10] sm:$0xff] }
  0x1d   :  { %241 = vmatpush.msra.mxu3 %v1396_v19  ;;  %167 = vmatpush.msra.mxu2 %v1414_v25  ;;  %1839 = vst [vmem:[#allocation15_spill] sm:$0xff] %v1476_v44  ;;  %v112_v46 = vld [vmem:[#allocation2] sm:$0x1]  ;;  %v1490_v48 = vld [vmem:[#allocation8 + $0x28] sm:$0xff] }
  0x1e   :  { %129 = vmatpush.msra.mxu0 %v1406_v23  ;;  %149 = vmatpush.msra.mxu1 %v1408_v24  ;;  %1840 = vst [vmem:[#allocation16_spill] sm:$0xff] %v1478_v45  ;;  %v1485_v47 = vld [vmem:[#allocation8 + $0x40] sm:$0xff] }
  0x1f   :  { %242 = vmatpush.msra.mxu3 %v1406_v23  ;;  %168 = vmatpush.msra.mxu2 %v1424_v28  ;;  %1841 = vst [vmem:[#allocation17_spill] sm:$0xff] %v1490_v48  ;;  %v113_v50 = vld [vmem:[#allocation3] ss:$8 sm:$0x7] }
  0x20   :  { %130 = vmatpush.msra.mxu0 %v1416_v26  ;;  %150 = vmatpush.msra.mxu1 %v1418_v27  ;;  %1842 = vst [vmem:[#allocation18_spill] sm:$0xff] %v1494_v49  ;;  %v115_v51 = vperm.slane %v113_v50, 0  ;;  %v116_v52 = vperm.slane %v113_v50, 1  ;;  %v117_v63 = vperm.slane %v113_v50, 2 }
  0x21   :  { %243 = vmatpush.msra.mxu3 %v1416_v26  ;;  %169 = vmatpush.msra.mxu2 %v1434_v31 }
  0x22   :  { %131 = vmatpush.msra.mxu0 %v1426_v29  ;;  %151 = vmatpush.msra.mxu1 %v1428_v30 }
  0x23   :  { %244 = vmatpush.msra.mxu3 %v1426_v29  ;;  %170 = vmatpush.msra.mxu2 %v1444_v34 }
  0x24   :  { %132 = vmatpush.msra.mxu0 %v1436_v32  ;;  %152 = vmatpush.msra.mxu1 %v1438_v33 }
  0x25   :  { %245 = vmatpush.msra.mxu3 %v1436_v32  ;;  %171 = vmatpush.msra.mxu2 %v1454_v37 }
  0x26   :  { %133 = vmatpush.msra.mxu0 %v1446_v35  ;;  %153 = vmatpush.msra.mxu1 %v1448_v36 }
  0x27   :  { %246 = vmatpush.msra.mxu3 %v1446_v35  ;;  %172 = vmatpush.msra.mxu2 %v1464_v40 }
  0x28   :  { %134 = vmatpush.msra.mxu0 %v1456_v38  ;;  %154 = vmatpush.msra.mxu1 %v1458_v39 }
  0x29   :  { %247 = vmatpush.msra.mxu3 %v1456_v38  ;;  %173 = vmatpush.msra.mxu2 %v1474_v43 }
  0x2a   :  { %135 = vmatpush.msra.mxu0 %v1466_v41  ;;  %155 = vmatpush.msra.mxu1 %v1468_v42 }
  0x2b   :  { %248 = vmatpush.msra.mxu3 %v1466_v41  ;;  %174 = vmatpush.msra.mxu2 %v1485_v47 }
  0x2c   :  { %136 = vmatpush.msra.mxu0 %v1476_v44  ;;  %156 = vmatpush.msra.mxu1 %v1478_v45 }
  0x2d   :  { %137 = vmatmul.f32.vlgmr.msra.gmra.mxu0 %v112_v46  ;;  %157 = vmatmul.f32.vlgmr.msra.gmra.mxu1 %v112_v46 }
  0x2e   :  { %254 = vmatpush.msrb.mxu0 %v1340_v1  ;;  %274 = vmatpush.msrb.mxu1 %v1362_v8 }
  0x2f   :  { %249 = vmatpush.msra.mxu3 %v1476_v44  ;;  %175 = vmatpush.msra.mxu2 %v1490_v48 }
  0x30   :  { %255 = vmatpush.msrb.mxu0 %v1346_v3  ;;  %275 = vmatpush.msrb.mxu1 %v1369_v11 }
  0x31   :  { %367 = vmatpush.msrb.mxu3 %v1340_v1  ;;  %176 = vmatpush.msra.mxu2 %v1494_v49 }
  0x32   :  { %256 = vmatpush.msrb.mxu0 %v1350_v5  ;;  %177 = vmatmul.f32.vlgmr.msra.gmra.mxu2 %v112_v46 }
  0x33   :  { %276 = vmatpush.msrb.mxu1 %v1374_v12  ;;  %347 = vmatpush.msrb.mxu2 %v1338_v0 }
  0x34   :  { %257 = vmatpush.msrb.mxu0 %v1357_v7  ;;  %368 = vmatpush.msrb.mxu3 %v1346_v3 }
  0x35   :  { %277 = vmatpush.msrb.mxu1 %v1384_v15  ;;  %348 = vmatpush.msrb.mxu2 %v1342_v2 }
  0x36   :  { %258 = vmatpush.msrb.mxu0 %v1366_v10  ;;  %369 = vmatpush.msrb.mxu3 %v1350_v5 }
  0x37   :  { %278 = vmatpush.msrb.mxu1 %v1394_v18  ;;  %349 = vmatpush.msrb.mxu2 %v1348_v4 }
  0x38   :  { %259 = vmatpush.msrb.mxu0 %v1378_v14  ;;  %370 = vmatpush.msrb.mxu3 %v1357_v7 }
  0x39   :  { %279 = vmatpush.msrb.mxu1 %v1404_v21  ;;  %350 = vmatpush.msrb.mxu2 %v1355_v6 }
  0x3a   :  { %260 = vmatpush.msrb.mxu0 %v1388_v17  ;;  %371 = vmatpush.msrb.mxu3 %v1366_v10 }
  0x3b   :  { %280 = vmatpush.msrb.mxu1 %v1414_v25  ;;  %351 = vmatpush.msrb.mxu2 %v1364_v9 }
  0x3c   :  { %261 = vmatpush.msrb.mxu0 %v1398_v20  ;;  %372 = vmatpush.msrb.mxu3 %v1378_v14 }
  0x3d   :  { %281 = vmatpush.msrb.mxu1 %v1424_v28  ;;  %352 = vmatpush.msrb.mxu2 %v1376_v13 }
  0x3e   :  { %262 = vmatpush.msrb.mxu0 %v1408_v24  ;;  %373 = vmatpush.msrb.mxu3 %v1388_v17 }
  0x3f   :  { %282 = vmatpush.msrb.mxu1 %v1434_v31  ;;  %353 = vmatpush.msrb.mxu2 %v1386_v16 }
  0x40   :  { %263 = vmatpush.msrb.mxu0 %v1418_v27  ;;  %374 = vmatpush.msrb.mxu3 %v1398_v20 }
  0x41   :  { %283 = vmatpush.msrb.mxu1 %v1444_v34  ;;  %354 = vmatpush.msrb.mxu2 %v1396_v19 }
  0x42   :  { %264 = vmatpush.msrb.mxu0 %v1428_v30  ;;  %375 = vmatpush.msrb.mxu3 %v1408_v24 }
  0x43   :  { %284 = vmatpush.msrb.mxu1 %v1454_v37  ;;  %355 = vmatpush.msrb.mxu2 %v1406_v23 }
  0x44   :  { %265 = vmatpush.msrb.mxu0 %v1438_v33  ;;  %376 = vmatpush.msrb.mxu3 %v1418_v27 }
  0x45   :  { %285 = vmatpush.msrb.mxu1 %v1464_v40  ;;  %356 = vmatpush.msrb.mxu2 %v1416_v26 }
  0x46   :  { %266 = vmatpush.msrb.mxu0 %v1448_v36  ;;  %377 = vmatpush.msrb.mxu3 %v1428_v30 }
  0x47   :  { %286 = vmatpush.msrb.mxu1 %v1474_v43  ;;  %357 = vmatpush.msrb.mxu2 %v1426_v29 }
  0x48   :  { %267 = vmatpush.msrb.mxu0 %v1458_v39  ;;  %378 = vmatpush.msrb.mxu3 %v1438_v33 }
  0x49   :  { %287 = vmatpush.msrb.mxu1 %v1485_v47  ;;  %358 = vmatpush.msrb.mxu2 %v1436_v32 }
  0x4a   :  { %268 = vmatpush.msrb.mxu0 %v1468_v42  ;;  %379 = vmatpush.msrb.mxu3 %v1448_v36 }
  0x4b   :  { %288 = vmatpush.msrb.mxu1 %v1490_v48  ;;  %359 = vmatpush.msrb.mxu2 %v1446_v35 }
  0x4c   :  { %269 = vmatpush.msrb.mxu0 %v1478_v45  ;;  %380 = vmatpush.msrb.mxu3 %v1458_v39 }
  0x4d   :  { %289 = vmatpush.msrb.mxu1 %v1494_v49  ;;  %360 = vmatpush.msrb.mxu2 %v1456_v38 }
  0x4e   :  { %387 = vmatpush.msra.mxu0 %v1362_v8  ;;  %381 = vmatpush.msrb.mxu3 %v1468_v42 }
  0x4f   :  { %460 = vmatpush.msra.mxu1 %v1338_v0  ;;  %361 = vmatpush.msrb.mxu2 %v1466_v41 }
  0x50   :  { %388 = vmatpush.msra.mxu0 %v1369_v11  ;;  %382 = vmatpush.msrb.mxu3 %v1478_v45 }
  0x51   :  { %461 = vmatpush.msra.mxu1 %v1342_v2  ;;  %362 = vmatpush.msrb.mxu2 %v1476_v44 }
  0x52   :  { %389 = vmatpush.msra.mxu0 %v1374_v12 }
  0x53   :  { %480 = vmatpush.msra.mxu2 %v1340_v1  ;;  %462 = vmatpush.msra.mxu1 %v1348_v4 }
  0x54   :  { %390 = vmatpush.msra.mxu0 %v1384_v15 }
  0x55   :  { %481 = vmatpush.msra.mxu2 %v1346_v3  ;;  %463 = vmatpush.msra.mxu1 %v1355_v6 }
  0x56   :  { %391 = vmatpush.msra.mxu0 %v1394_v18 }
  0x57   :  { %482 = vmatpush.msra.mxu2 %v1350_v5  ;;  %464 = vmatpush.msra.mxu1 %v1364_v9 }
  0x58   :  { %392 = vmatpush.msra.mxu0 %v1404_v21 }
  0x59   :  { %483 = vmatpush.msra.mxu2 %v1357_v7  ;;  %465 = vmatpush.msra.mxu1 %v1376_v13 }
  0x5a   :  { %393 = vmatpush.msra.mxu0 %v1414_v25 }
  0x5b   :  { %484 = vmatpush.msra.mxu2 %v1366_v10  ;;  %466 = vmatpush.msra.mxu1 %v1386_v16 }
  0x5c   :  { %394 = vmatpush.msra.mxu0 %v1424_v28 }
  0x5d   :  { %485 = vmatpush.msra.mxu2 %v1378_v14  ;;  %467 = vmatpush.msra.mxu1 %v1396_v19 }
  0x5e   :  { %395 = vmatpush.msra.mxu0 %v1434_v31 }
  0x5f   :  { %486 = vmatpush.msra.mxu2 %v1388_v17  ;;  %468 = vmatpush.msra.mxu1 %v1406_v23 }
  0x60   :  { %396 = vmatpush.msra.mxu0 %v1444_v34 }
  0x61   :  { %487 = vmatpush.msra.mxu2 %v1398_v20  ;;  %469 = vmatpush.msra.mxu1 %v1416_v26 }
  0x62   :  { %397 = vmatpush.msra.mxu0 %v1454_v37 }
  0x63   :  { %488 = vmatpush.msra.mxu2 %v1408_v24  ;;  %470 = vmatpush.msra.mxu1 %v1426_v29 }
  0x64   :  { %398 = vmatpush.msra.mxu0 %v1464_v40 }
  0x65   :  { %489 = vmatpush.msra.mxu2 %v1418_v27  ;;  %471 = vmatpush.msra.mxu1 %v1436_v32 }
  0x66   :  { %399 = vmatpush.msra.mxu0 %v1474_v43 }
  0x67   :  { %490 = vmatpush.msra.mxu2 %v1428_v30  ;;  %472 = vmatpush.msra.mxu1 %v1446_v35 }
  0x68   :  { %400 = vmatpush.msra.mxu0 %v1485_v47 }
  0x69   :  { %491 = vmatpush.msra.mxu2 %v1438_v33  ;;  %473 = vmatpush.msra.mxu1 %v1456_v38 }
  0x6a   :  { %401 = vmatpush.msra.mxu0 %v1490_v48 }
  0x6b   :  { %492 = vmatpush.msra.mxu2 %v1448_v36  ;;  %474 = vmatpush.msra.mxu1 %v1466_v41 }
  0x6c   :  { %402 = vmatpush.msra.mxu0 %v1494_v49 }
  0x6d   :  { %493 = vmatpush.msra.mxu2 %v1458_v39  ;;  %475 = vmatpush.msra.mxu1 %v1476_v44 }
  0x6f   :  { %494 = vmatpush.msra.mxu2 %v1468_v42 }
  0x71   :  { %495 = vmatpush.msra.mxu2 %v1478_v45 }
  0xaa   :  { %v138_v53 = vpop.f32.mrf.mxu0  ;;  %v158_v54 = vpop.f32.mrf.mxu1 }
  0xab   :  { %v139_v55 = vadd.f32 %v138_v53, %v115_v51  ;;  %v159_v56 = vadd.f32 %v158_v54, %v116_v52 }
  0xad   :  { %v1035_v57 = vmul.f32 -1.442695, %v139_v55  ;;  %v1036_v58 = vmul.f32 -1.442695, %v159_v56 }
  0xaf   :  { %1057 = vpow2.f32 %v1035_v57 }
  0xb0   :  { %1059 = vpow2.f32 %v1036_v58 }
  0xb5   :  { %v1058_v59 = vpop.eup %1057  ;;  %v178_v22 = vpop.f32.mrf.mxu2 }
  0xb6   :  { %v1060_v60 = vpop.eup %1059  ;;  %v184_v61 = vadd.f32 1.0, %v1058_v59  ;;  %v179_v46 = vadd.f32 %v178_v22, %v117_v63 }
  0xb7   :  { %v203_v62 = vadd.f32 1.0, %v1060_v60 }
  0xb8   :  { %1061 = vrcp.f32 %v184_v61  ;;  %v196_v53 = vand.u32 2147483648, %v184_v61  ;;  %v194_v55 = vand.u32 2147483647, %v184_v61  ;;  %vm190_vm1 = vweird.f32 %v184_v61 }
  0xb9   :  { %1063 = vrcp.f32 %v203_v62  ;;  %vm209_vm4 = vweird.f32 %v203_v62 }
  0xba   :  { %1065 = vtanh.f32 %v179_v46  ;;  %v197_v58 = vor.u32 1.1754944e-38, %v196_v53  ;;  %vm195_vm3 = vcmp.eq.f32.partialorder %v194_v55, 8.507059e+37  ;;  %v226_v53 = vld [vmem:[#allocation3 + $0x1] ss:$8 sm:$0x7] }
  0xbb   :  { %v229_v55 = vperm.slane %v226_v53, 1 }
  0xbe   :  { %v1062_v45 = vpop.eup %1061 }
  0xbf   :  { %v1064_v44 = vpop.eup %1063  ;;  %v186_v49 = vmul.f32 %v1062_v45, %v184_v61  ;;  %vm191_vm0 = vweird.f32 %v1062_v45 }
  0xc0   :  { %v205_v42 = vmul.f32 %v1064_v44, %v203_v62  ;;  %v1066_v57 = vpop.eup %1065  ;;  %vm192_vm2 = vmor %vm190_vm1, %vm191_vm0  ;;  %vm210_vm5 = vweird.f32 %v1064_v44 }
  0xc1   :  { %v187_v51 = vsub.f32 1.0, %v186_v49  ;;  %v213_v49 = vand.u32 2147483647, %v203_v62  ;;  %vm211_vm6 = vmor %vm209_vm4, %vm210_vm5 }
  0xc2   :  { %v206_v52 = vsub.f32 1.0, %v205_v42  ;;  %v215_v42 = vand.u32 2147483648, %v203_v62  ;;  %v1846_v62 = vld [vmem:[#allocation15_spill] sm:$0xff] }
  0xc3   :  { %v188_v54 = vmul.f32 %v1062_v45, %v187_v51  ;;  %vm214_vm7 = vcmp.eq.f32.partialorder %v213_v49, 8.507059e+37 }
  0xc4   :  { %v207_v50 = vmul.f32 %v1064_v44, %v206_v52  ;;  %v216_v51 = vor.u32 1.1754944e-38, %v215_v42  ;;  %v1847_v52 = vld [vmem:[#allocation16_spill] sm:$0xff] }
  0xc5   :  { %v189_v56 = vadd.f32 %v1062_v45, %v188_v54 }
  0xc6   :  { %v208_v22 = vadd.f32 %v1064_v44, %v207_v50  ;;  %v228_v50 = vperm.slane %v226_v53, 0 }
  0xc7   :  { %v193_v59 = vsel %vm192_vm2, %v1062_v45, %v189_v56  ;;  %v1845_v45 = vld [vmem:[#allocation18_spill] sm:$0xff] }
  0xc8   :  { %v198_v60 = vsel %vm195_vm3, %v197_v58, %v193_v59  ;;  %v212_v46 = vsel %vm211_vm6, %v1064_v44, %v208_v22  ;;  %v1844_v44 = vld [vmem:[#allocation14_spill] sm:$0xff] }
  0xc9   :  { %v220_v63 = vmul.f32 %v1066_v57, %v198_v60  ;;  %v217_v54 = vsel %vm214_vm7, %v216_v51, %v212_v46  ;;  %v230_v51 = vperm.slane %v226_v53, 2 }
  0xcb   :  { %1067 = vtanh.f32 %v220_v63  ;;  %224 = vst [vmem:[#allocation9 + $0x8] sm:$0x1] %v220_v63 }
  0xd1   :  { %v1068_v61 = vpop.eup %1067 }
  0xd2   :  { %v222_v41 = vmul.f32 %v1068_v61, %v217_v54 }
  0xd4   :  { %223 = vst [vmem:[#allocation9] sm:$0x1] %v222_v41  ;;  %250 = vmatmul.f32.vlgmr.msra.gmra.mxu3 %v222_v41  ;;  %270 = vmatmul.f32.vlgmr.msrb.gmra.mxu0 %v222_v41 }
  0xd5   :  { %290 = vmatmul.f32.vlgmr.msrb.gmra.mxu1 %v222_v41  ;;  %500 = vmatpush.msra.mxu3 %v1362_v8  ;;  %v1843_v41 = vld [vmem:[#allocation13_spill] sm:$0xff] }
  0xd6   :  { %573 = vmatpush.msrb.mxu0 %v1338_v0  ;;  %593 = vmatpush.msrb.mxu1 %v1340_v1 }
  0xd7   :  { %501 = vmatpush.msra.mxu3 %v1369_v11 }
  0xd8   :  { %574 = vmatpush.msrb.mxu0 %v1342_v2  ;;  %594 = vmatpush.msrb.mxu1 %v1346_v3 }
  0xd9   :  { %502 = vmatpush.msra.mxu3 %v1374_v12 }
  0xda   :  { %575 = vmatpush.msrb.mxu0 %v1348_v4  ;;  %595 = vmatpush.msrb.mxu1 %v1350_v5 }
  0xdb   :  { %503 = vmatpush.msra.mxu3 %v1384_v15 }
  0xdc   :  { %576 = vmatpush.msrb.mxu0 %v1355_v6  ;;  %596 = vmatpush.msrb.mxu1 %v1357_v7 }
  0xdd   :  { %504 = vmatpush.msra.mxu3 %v1394_v18 }
  0xde   :  { %577 = vmatpush.msrb.mxu0 %v1364_v9  ;;  %597 = vmatpush.msrb.mxu1 %v1366_v10 }
  0xdf   :  { %505 = vmatpush.msra.mxu3 %v1404_v21 }
  0xe0   :  { %578 = vmatpush.msrb.mxu0 %v1376_v13  ;;  %598 = vmatpush.msrb.mxu1 %v1378_v14 }
  0xe1   :  { %506 = vmatpush.msra.mxu3 %v1414_v25 }
  0xe2   :  { %579 = vmatpush.msrb.mxu0 %v1386_v16  ;;  %599 = vmatpush.msrb.mxu1 %v1388_v17 }
  0xe3   :  { %507 = vmatpush.msra.mxu3 %v1424_v28 }
  0xe4   :  { %580 = vmatpush.msrb.mxu0 %v1396_v19  ;;  %600 = vmatpush.msrb.mxu1 %v1398_v20 }
  0xe5   :  { %508 = vmatpush.msra.mxu3 %v1434_v31 }
  0xe6   :  { %581 = vmatpush.msrb.mxu0 %v1406_v23  ;;  %601 = vmatpush.msrb.mxu1 %v1408_v24 }
  0xe7   :  { %509 = vmatpush.msra.mxu3 %v1444_v34 }
  0xe8   :  { %582 = vmatpush.msrb.mxu0 %v1416_v26  ;;  %602 = vmatpush.msrb.mxu1 %v1418_v27 }
  0xe9   :  { %510 = vmatpush.msra.mxu3 %v1454_v37 }
  0xea   :  { %583 = vmatpush.msrb.mxu0 %v1426_v29  ;;  %603 = vmatpush.msrb.mxu1 %v1428_v30 }
  0xeb   :  { %511 = vmatpush.msra.mxu3 %v1464_v40 }
  0xec   :  { %584 = vmatpush.msrb.mxu0 %v1436_v32  ;;  %604 = vmatpush.msrb.mxu1 %v1438_v33 }
  0xed   :  { %512 = vmatpush.msra.mxu3 %v1474_v43 }
  0xee   :  { %585 = vmatpush.msrb.mxu0 %v1446_v35  ;;  %605 = vmatpush.msrb.mxu1 %v1448_v36 }
  0xef   :  { %513 = vmatpush.msra.mxu3 %v1485_v47 }
  0xf0   :  { %586 = vmatpush.msrb.mxu0 %v1456_v38  ;;  %606 = vmatpush.msrb.mxu1 %v1458_v39 }
  0xf1   :  { %514 = vmatpush.msra.mxu3 %v1490_v48 }
  0xf2   :  { %587 = vmatpush.msrb.mxu0 %v1843_v41  ;;  %607 = vmatpush.msrb.mxu1 %v1844_v44 }
  0xf3   :  { %515 = vmatpush.msra.mxu3 %v1845_v45 }
  0xf4   :  { %588 = vmatpush.msrb.mxu0 %v1846_v62  ;;  %608 = vmatpush.msrb.mxu1 %v1847_v52 }
 0x151   :  { %v271_v56 = vpop.f32.mrf.mxu0 }
 0x152   :  { %v272_v57 = vadd.f32 %v271_v56, %v229_v55  ;;  %v291_v54 = vpop.f32.mrf.mxu1 }
 0x153   :  { %v292_v45 = vadd.f32 %v291_v54, %v230_v51 }
 0x154   :  { %v1038_v58 = vmul.f32 -1.442695, %v272_v57 }
 0x156   :  { %1069 = vpow2.f32 %v1038_v58 }
 0x157   :  { %v251_v59 = vpop.f32.mrf.mxu3 }
 0x158   :  { %v252_v60 = vadd.f32 %v251_v59, %v228_v50 }
 0x15a   :  { %v1037_v63 = vmul.f32 -1.442695, %v252_v60 }
 0x15c   :  { %v1070_v22 = vpop.eup %1069  ;;  %1071 = vpow2.f32 %v1037_v63 }
 0x15d   :  { %v316_v42 = vadd.f32 1.0, %v1070_v22 }
 0x15f   :  { %1073 = vrcp.f32 %v316_v42  ;;  %v328_v51 = vand.u32 2147483648, %v316_v42  ;;  %vm322_vm13 = vweird.f32 %v316_v42 }
 0x161   :  { %v329_v54 = vor.u32 1.1754944e-38, %v328_v51 }
 0x162   :  { %v1072_v49 = vpop.eup %1071 }
 0x163   :  { %v297_v46 = vadd.f32 1.0, %v1072_v49 }
 0x165   :  { %1075 = vrcp.f32 %v297_v46  ;;  %v1074_v61 = vpop.eup %1073  ;;  %v309_v58 = vand.u32 2147483648, %v297_v46  ;;  %v307_v59 = vand.u32 2147483647, %v297_v46  ;;  %vm303_vm9 = vweird.f32 %v297_v46 }
 0x166   :  { %v318_v62 = vmul.f32 %v1074_v61, %v316_v42  ;;  %1077 = vtanh.f32 %v292_v45  ;;  %vm323_vm12 = vweird.f32 %v1074_v61  ;;  %v326_v45 = vand.u32 2147483647, %v316_v42  ;;  %v1852_v42 = vld [vmem:[#allocation15_spill] sm:$0xff] }
 0x167   :  { %v310_v63 = vor.u32 1.1754944e-38, %v309_v58  ;;  %vm308_vm11 = vcmp.eq.f32.partialorder %v307_v59, 8.507059e+37  ;;  %vm324_vm14 = vmor %vm322_vm13, %vm323_vm12 }
 0x168   :  { %v319_v57 = vsub.f32 1.0, %v318_v62  ;;  %vm327_vm15 = vcmp.eq.f32.partialorder %v326_v45, 8.507059e+37 }
 0x16a   :  { %v320_v22 = vmul.f32 %v1074_v61, %v319_v57  ;;  %v339_v57 = vld [vmem:[#allocation3 + $0x2] ss:$8 sm:$0x7] }
 0x16b   :  { %v1076_v52 = vpop.eup %1075  ;;  %v341_v58 = vperm.slane %v339_v57, 0 }
 0x16c   :  { %v299_v55 = vmul.f32 %v1076_v52, %v297_v46  ;;  %vm304_vm8 = vweird.f32 %v1076_v52  ;;  %v1078_v53 = vpop.eup %1077  ;;  %v321_v48 = vadd.f32 %v1074_v61, %v320_v22 }
 0x16d   :  { %vm305_vm10 = vmor %vm303_vm9, %vm304_vm8 }
 0x16e   :  { %v300_v56 = vsub.f32 1.0, %v299_v55  ;;  %v325_v62 = vsel %vm324_vm14, %v1074_v61, %v321_v48  ;;  %v1848_v48 = vld [vmem:[#allocation17_spill] sm:$0xff]  ;;  %v1853_v61 = vld [vmem:[#allocation16_spill] sm:$0xff] }
 0x16f   :  { %v330_v55 = vsel %vm327_vm15, %v329_v54, %v325_v62 }
 0x170   :  { %v301_v50 = vmul.f32 %v1076_v52, %v300_v56 }
 0x172   :  { %v302_v60 = vadd.f32 %v1076_v52, %v301_v50  ;;  %v342_v50 = vperm.slane %v339_v57, 1 }
 0x174   :  { %v306_v49 = vsel %vm305_vm10, %v1076_v52, %v302_v60  ;;  %v1851_v52 = vld [vmem:[#allocation18_spill] sm:$0xff] }
 0x175   :  { %v311_v44 = vsel %vm308_vm11, %v310_v63, %v306_v49 }
 0x176   :  { %v333_v41 = vmul.f32 %v1078_v53, %v311_v44  ;;  %v1850_v44 = vld [vmem:[#allocation14_spill] sm:$0xff] }
 0x178   :  { %1079 = vtanh.f32 %v333_v41  ;;  %337 = vst [vmem:[#allocation9 + $0x9] sm:$0x1] %v333_v41  ;;  %v1849_v41 = vld [vmem:[#allocation13_spill] sm:$0xff] }
 0x17e   :  { %v1080_v46 = vpop.eup %1079 }
 0x17f   :  { %v335_v56 = vmul.f32 %v1080_v46, %v330_v55  ;;  %v343_v46 = vperm.slane %v339_v57, 2 }
 0x181   :  { %336 = vst [vmem:[#allocation9 + $0x1] sm:$0x1] %v335_v56  ;;  %363 = vmatmul.f32.vlgmr.msrb.gmra.mxu2 %v335_v56  ;;  %383 = vmatmul.f32.vlgmr.msrb.gmra.mxu3 %v335_v56 }
 0x182   :  { %403 = vmatmul.f32.vlgmr.msra.gmra.mxu0 %v335_v56  ;;  %613 = vmatpush.msrb.mxu2 %v1362_v8 }
 0x183   :  { %686 = vmatpush.msrb.mxu3 %v1338_v0  ;;  %706 = vmatpush.msra.mxu0 %v1340_v1 }
 0x184   :  { %614 = vmatpush.msrb.mxu2 %v1369_v11 }
 0x185   :  { %687 = vmatpush.msrb.mxu3 %v1342_v2  ;;  %707 = vmatpush.msra.mxu0 %v1346_v3 }
 0x186   :  { %615 = vmatpush.msrb.mxu2 %v1374_v12 }
 0x187   :  { %688 = vmatpush.msrb.mxu3 %v1348_v4  ;;  %708 = vmatpush.msra.mxu0 %v1350_v5 }
 0x188   :  { %616 = vmatpush.msrb.mxu2 %v1384_v15 }
 0x189   :  { %689 = vmatpush.msrb.mxu3 %v1355_v6  ;;  %709 = vmatpush.msra.mxu0 %v1357_v7 }
 0x18a   :  { %617 = vmatpush.msrb.mxu2 %v1394_v18 }
 0x18b   :  { %690 = vmatpush.msrb.mxu3 %v1364_v9  ;;  %710 = vmatpush.msra.mxu0 %v1366_v10 }
 0x18c   :  { %618 = vmatpush.msrb.mxu2 %v1404_v21 }
 0x18d   :  { %691 = vmatpush.msrb.mxu3 %v1376_v13  ;;  %711 = vmatpush.msra.mxu0 %v1378_v14 }
 0x18e   :  { %619 = vmatpush.msrb.mxu2 %v1414_v25 }
 0x18f   :  { %692 = vmatpush.msrb.mxu3 %v1386_v16  ;;  %712 = vmatpush.msra.mxu0 %v1388_v17 }
 0x190   :  { %620 = vmatpush.msrb.mxu2 %v1424_v28 }
 0x191   :  { %693 = vmatpush.msrb.mxu3 %v1396_v19  ;;  %713 = vmatpush.msra.mxu0 %v1398_v20 }
 0x192   :  { %621 = vmatpush.msrb.mxu2 %v1434_v31 }
 0x193   :  { %694 = vmatpush.msrb.mxu3 %v1406_v23  ;;  %714 = vmatpush.msra.mxu0 %v1408_v24 }
 0x194   :  { %622 = vmatpush.msrb.mxu2 %v1444_v34 }
 0x195   :  { %695 = vmatpush.msrb.mxu3 %v1416_v26  ;;  %715 = vmatpush.msra.mxu0 %v1418_v27 }
 0x196   :  { %623 = vmatpush.msrb.mxu2 %v1454_v37 }
 0x197   :  { %696 = vmatpush.msrb.mxu3 %v1426_v29  ;;  %716 = vmatpush.msra.mxu0 %v1428_v30 }
 0x198   :  { %624 = vmatpush.msrb.mxu2 %v1464_v40 }
 0x199   :  { %697 = vmatpush.msrb.mxu3 %v1436_v32  ;;  %717 = vmatpush.msra.mxu0 %v1438_v33 }
 0x19a   :  { %625 = vmatpush.msrb.mxu2 %v1474_v43 }
 0x19b   :  { %698 = vmatpush.msrb.mxu3 %v1446_v35  ;;  %718 = vmatpush.msra.mxu0 %v1448_v36 }
 0x19c   :  { %626 = vmatpush.msrb.mxu2 %v1485_v47 }
 0x19d   :  { %699 = vmatpush.msrb.mxu3 %v1456_v38  ;;  %719 = vmatpush.msra.mxu0 %v1458_v39 }
 0x19e   :  { %627 = vmatpush.msrb.mxu2 %v1848_v48 }
 0x19f   :  { %700 = vmatpush.msrb.mxu3 %v1849_v41  ;;  %720 = vmatpush.msra.mxu0 %v1850_v44 }
 0x1a0   :  { %628 = vmatpush.msrb.mxu2 %v1851_v52 }
 0x1a1   :  { %701 = vmatpush.msrb.mxu3 %v1852_v42  ;;  %721 = vmatpush.msra.mxu0 %v1853_v61 }
 0x1ff   :  { %v404_v55 = vpop.f32.mrf.mxu0 }
 0x200   :  { %v405_v61 = vadd.f32 %v404_v55, %v343_v46 }
 0x204   :  { %v364_v59 = vpop.f32.mrf.mxu2  ;;  %v384_v60 = vpop.f32.mrf.mxu3 }
 0x205   :  { %v365_v63 = vadd.f32 %v364_v59, %v341_v58  ;;  %v385_v22 = vadd.f32 %v384_v60, %v342_v50 }
 0x207   :  { %v1039_v49 = vmul.f32 -1.442695, %v365_v63  ;;  %v1040_v53 = vmul.f32 -1.442695, %v385_v22 }
 0x209   :  { %1081 = vpow2.f32 %v1039_v49 }
 0x20a   :  { %1083 = vpow2.f32 %v1040_v53 }
 0x20f   :  { %v1082_v51 = vpop.eup %1081 }
 0x210   :  { %v1084_v45 = vpop.eup %1083  ;;  %v410_v62 = vadd.f32 1.0, %v1082_v51 }
 0x211   :  { %v429_v54 = vadd.f32 1.0, %v1084_v45 }
 0x212   :  { %1085 = vrcp.f32 %v410_v62  ;;  %v422_v58 = vand.u32 2147483648, %v410_v62  ;;  %v420_v60 = vand.u32 2147483647, %v410_v62  ;;  %vm416_vm1 = vweird.f32 %v410_v62 }
 0x213   :  { %1087 = vrcp.f32 %v429_v54  ;;  %v441_v55 = vand.u32 2147483648, %v429_v54  ;;  %vm435_vm5 = vweird.f32 %v429_v54 }
 0x214   :  { %1089 = vtanh.f32 %v405_v61  ;;  %v423_v22 = vor.u32 1.1754944e-38, %v422_v58  ;;  %vm421_vm3 = vcmp.eq.f32.partialorder %v420_v60, 8.507059e+37  ;;  %v1757_v60 = vld [vmem:[#allocation8 + $0x160] sm:$0xff] }
 0x218   :  { %v1086_v56 = vpop.eup %1085 }
 0x219   :  { %v1088_v42 = vpop.eup %1087  ;;  %v412_v52 = vmul.f32 %v1086_v56, %v410_v62  ;;  %vm417_vm0 = vweird.f32 %v1086_v56 }
 0x21a   :  { %v431_v44 = vmul.f32 %v1088_v42, %v429_v54  ;;  %vm418_vm2 = vmor %vm416_vm1, %vm417_vm0  ;;  %v1090_v57 = vpop.eup %1089  ;;  %vm436_vm4 = vweird.f32 %v1088_v42 }
 0x21b   :  { %v413_v41 = vsub.f32 1.0, %v412_v52  ;;  %vm437_vm6 = vmor %vm435_vm5, %vm436_vm4  ;;  %v442_v52 = vor.u32 1.1754944e-38, %v441_v55  ;;  %v1766_v55 = vld [vmem:[#allocation8 + $0x118] sm:$0xff] }
 0x21c   :  { %v432_v50 = vsub.f32 1.0, %v431_v44  ;;  %v439_v44 = vand.u32 2147483647, %v429_v54 }
 0x21d   :  { %v414_v59 = vmul.f32 %v1086_v56, %v413_v41 }
 0x21e   :  { %v433_v49 = vmul.f32 %v1088_v42, %v432_v50  ;;  %vm440_vm7 = vcmp.eq.f32.partialorder %v439_v44, 8.507059e+37  ;;  %v1154_v50 = vld [vmem:[#allocation8 + $0x168] sm:$0xff] }
 0x21f   :  { %v415_v63 = vadd.f32 %v1086_v56, %v414_v59  ;;  %v1155_v59 = vld [vmem:[#allocation8 + $0x170] sm:$0xff]  ;;  %v1166_v44 = vld [vmem:[#allocation8 + $0x108] sm:$0xff] }
 0x220   :  { %v434_v46 = vadd.f32 %v1088_v42, %v433_v49  ;;  %v1760_v49 = vld [vmem:[#allocation8 + $0x148] sm:$0xff] }
 0x221   :  { %v419_v53 = vsel %vm418_vm2, %v1086_v56, %v415_v63  ;;  %v1754_v56 = vld [vmem:[#allocation8 + $0x178] sm:$0xff]  ;;  %v1157_v63 = vld [vmem:[#allocation8 + $0x150] sm:$0xff] }
 0x222   :  { %v424_v51 = vsel %vm421_vm3, %v423_v22, %v419_v53  ;;  %v438_v41 = vsel %vm437_vm6, %v1088_v42, %v434_v46  ;;  %v1158_v22 = vld [vmem:[#allocation8 + $0x158] sm:$0xff]  ;;  %v1164_v46 = vld [vmem:[#allocation8 + $0x128] sm:$0xff] }
 0x223   :  { %v446_v45 = vmul.f32 %v1090_v57, %v424_v51  ;;  %v443_v62 = vsel %vm440_vm7, %v442_v52, %v438_v41  ;;  %v1160_v53 = vld [vmem:[#allocation8 + $0x138] sm:$0xff]  ;;  %v1161_v57 = vld [vmem:[#allocation8 + $0x140] sm:$0xff]  ;;  %v1763_v51 = vld [vmem:[#allocation8 + $0x130] sm:$0xff] }
 0x224   :  { %v1167_v41 = vld [vmem:[#allocation8 + $0x110] sm:$0xff]  ;;  %v1769_v52 = vld [vmem:[#allocation8 + $0x100] sm:$0xff] }
 0x225   :  { %1091 = vtanh.f32 %v446_v45  ;;  %450 = vst [vmem:[#allocation9 + $0xa] sm:$0x1] %v446_v45  ;;  %v1163_v45 = vld [vmem:[#allocation8 + $0x120] sm:$0xff] }
 0x22b   :  { %v1092_v61 = vpop.eup %1091 }
 0x22c   :  { %v448_v58 = vmul.f32 %v1092_v61, %v443_v62  ;;  %v1169_v61 = vld [vmem:[#allocation8 + $0xf0] sm:$0xff]  ;;  %v1170_v62 = vld [vmem:[#allocation8 + $0xf8] sm:$0xff] }
 0x22e   :  { %449 = vst [vmem:[#allocation9 + $0x2] sm:$0x1] %v448_v58  ;;  %476 = vmatmul.f32.vlgmr.msra.gmra.mxu1 %v448_v58  ;;  %496 = vmatmul.f32.vlgmr.msra.gmra.mxu2 %v448_v58 }
 0x22f   :  { %516 = vmatmul.f32.vlgmr.msra.gmra.mxu3 %v448_v58  ;;  %726 = vmatpush.msra.mxu1 %v1362_v8  ;;  %v1772_v58 = vld [vmem:[#allocation8 + $0xe8] sm:$0xff] }
 0x230   :  { %799 = vmatpush.msra.mxu2 %v1338_v0  ;;  %819 = vmatpush.msra.mxu3 %v1340_v1  ;;  %v1854_v0 = vld [vmem:[#allocation13_spill] sm:$0xff]  ;;  %v1855_v1 = vld [vmem:[#allocation14_spill] sm:$0xff] }
 0x231   :  { %727 = vmatpush.msra.mxu1 %v1369_v11 }
 0x232   :  { %800 = vmatpush.msra.mxu2 %v1342_v2  ;;  %820 = vmatpush.msra.mxu3 %v1346_v3  ;;  %v1856_v2 = vld [vmem:[#allocation18_spill] sm:$0xff]  ;;  %v1857_v3 = vld [vmem:[#allocation15_spill] sm:$0xff] }
 0x233   :  { %728 = vmatpush.msra.mxu1 %v1374_v12 }
 0x234   :  { %801 = vmatpush.msra.mxu2 %v1348_v4  ;;  %821 = vmatpush.msra.mxu3 %v1350_v5  ;;  %v1858_v4 = vld [vmem:[#allocation16_spill] sm:$0xff] }
 0x235   :  { %729 = vmatpush.msra.mxu1 %v1384_v15  ;;  %v452_v5 = vld [vmem:[#allocation3 + $0x3] ss:$8 sm:$0x7] }
 0x236   :  { %802 = vmatpush.msra.mxu2 %v1355_v6  ;;  %822 = vmatpush.msra.mxu3 %v1357_v7  ;;  %v454_v6 = vperm.slane %v452_v5, 0 }
 0x237   :  { %730 = vmatpush.msra.mxu1 %v1394_v18 }
 0x238   :  { %803 = vmatpush.msra.mxu2 %v1364_v9  ;;  %823 = vmatpush.msra.mxu3 %v1366_v10  ;;  %v455_v10 = vperm.slane %v452_v5, 1 }
 0x239   :  { %731 = vmatpush.msra.mxu1 %v1404_v21 }
 0x23a   :  { %804 = vmatpush.msra.mxu2 %v1376_v13  ;;  %824 = vmatpush.msra.mxu3 %v1378_v14 }
 0x23b   :  { %732 = vmatpush.msra.mxu1 %v1414_v25 }
 0x23c   :  { %805 = vmatpush.msra.mxu2 %v1386_v16  ;;  %825 = vmatpush.msra.mxu3 %v1388_v17  ;;  %v456_v16 = vperm.slane %v452_v5, 2  ;;  %v1778_v5 = vld [vmem:[#allocation8 + $0xb8] sm:$0xff] }
 0x23d   :  { %733 = vmatpush.msra.mxu1 %v1424_v28 }
 0x23e   :  { %806 = vmatpush.msra.mxu2 %v1396_v19  ;;  %826 = vmatpush.msra.mxu3 %v1398_v20 }
 0x23f   :  { %734 = vmatpush.msra.mxu1 %v1434_v31 }
 0x240   :  { %807 = vmatpush.msra.mxu2 %v1406_v23  ;;  %827 = vmatpush.msra.mxu3 %v1408_v24 }
 0x241   :  { %735 = vmatpush.msra.mxu1 %v1444_v34 }
 0x242   :  { %808 = vmatpush.msra.mxu2 %v1416_v26  ;;  %828 = vmatpush.msra.mxu3 %v1418_v27 }
 0x243   :  { %736 = vmatpush.msra.mxu1 %v1454_v37 }
 0x244   :  { %809 = vmatpush.msra.mxu2 %v1426_v29  ;;  %829 = vmatpush.msra.mxu3 %v1428_v30 }
 0x245   :  { %737 = vmatpush.msra.mxu1 %v1464_v40 }
 0x246   :  { %810 = vmatpush.msra.mxu2 %v1436_v32  ;;  %830 = vmatpush.msra.mxu3 %v1438_v33 }
 0x247   :  { %738 = vmatpush.msra.mxu1 %v1474_v43 }
 0x248   :  { %811 = vmatpush.msra.mxu2 %v1446_v35  ;;  %831 = vmatpush.msra.mxu3 %v1448_v36 }
 0x249   :  { %739 = vmatpush.msra.mxu1 %v1485_v47 }
 0x24a   :  { %812 = vmatpush.msra.mxu2 %v1456_v38  ;;  %832 = vmatpush.msra.mxu3 %v1458_v39 }
 0x24b   :  { %740 = vmatpush.msra.mxu1 %v1848_v48 }
 0x24c   :  { %813 = vmatpush.msra.mxu2 %v1854_v0  ;;  %833 = vmatpush.msra.mxu3 %v1855_v1  ;;  %v1172_v0 = vld [vmem:[#allocation8 + $0xd8] sm:$0xff]  ;;  %v1173_v1 = vld [vmem:[#allocation8 + $0xe0] sm:$0xff] }
 0x24d   :  { %741 = vmatpush.msra.mxu1 %v1856_v2  ;;  %v1775_v2 = vld [vmem:[#allocation8 + $0xd0] sm:$0xff] }
 0x24e   :  { %814 = vmatpush.msra.mxu2 %v1857_v3  ;;  %834 = vmatpush.msra.mxu3 %v1858_v4  ;;  %v1175_v3 = vld [vmem:[#allocation8 + $0xc0] sm:$0xff]  ;;  %v1176_v4 = vld [vmem:[#allocation8 + $0xc8] sm:$0xff] }
 0x2ab   :  { %v477_v7 = vpop.f32.mrf.mxu1 }
 0x2ac   :  { %v478_v8 = vadd.f32 %v477_v7, %v454_v6  ;;  %v1178_v6 = vld [vmem:[#allocation8 + $0xa8] sm:$0xff]  ;;  %v1179_v7 = vld [vmem:[#allocation8 + $0xb0] sm:$0xff] }
 0x2ae   :  { %v1041_v9 = vmul.f32 -1.442695, %v478_v8  ;;  %v1781_v8 = vld [vmem:[#allocation8 + $0xa0] sm:$0xff] }
 0x2b0   :  { %1093 = vpow2.f32 %v1041_v9  ;;  %v1181_v9 = vld [vmem:[#allocation8 + $0x90] sm:$0xff] }
 0x2b1   :  { %v497_v11 = vpop.f32.mrf.mxu2 }
 0x2b2   :  { %v498_v12 = vadd.f32 %v497_v11, %v455_v10  ;;  %v517_v18 = vpop.f32.mrf.mxu3  ;;  %v1182_v10 = vld [vmem:[#allocation8 + $0x98] sm:$0xff]  ;;  %v1784_v11 = vld [vmem:[#allocation8 + $0x88] sm:$0xff] }
 0x2b3   :  { %v518_v21 = vadd.f32 %v517_v18, %v456_v16  ;;  %v1188_v16 = vld [vmem:[#allocation8 + $0x68] sm:$0xff] }
 0x2b4   :  { %v1042_v13 = vmul.f32 -1.442695, %v498_v12  ;;  %v1184_v12 = vld [vmem:[#allocation8 + $0x78] sm:$0xff]  ;;  %v1190_v18 = vld [vmem:[#allocation8 + $0x48] sm:$0xff] }
 0x2b6   :  { %v1094_v14 = vpop.eup %1093  ;;  %1095 = vpow2.f32 %v1042_v13  ;;  %v1185_v13 = vld [vmem:[#allocation8 + $0x80] sm:$0xff] }
 0x2b7   :  { %v523_v15 = vadd.f32 1.0, %v1094_v14  ;;  %v1787_v14 = vld [vmem:[#allocation8 + $0x70] sm:$0xff] }
 0x2b9   :  { %1097 = vrcp.f32 %v523_v15  ;;  %v535_v25 = vand.u32 2147483648, %v523_v15  ;;  %v533_v27 = vand.u32 2147483647, %v523_v15  ;;  %vm529_vm9 = vweird.f32 %v523_v15 }
 0x2bb   :  { %v536_v31 = vor.u32 1.1754944e-38, %v535_v25  ;;  %vm534_vm11 = vcmp.eq.f32.partialorder %v533_v27, 8.507059e+37  ;;  %v1196_v25 = vld [vmem:[#allocation8 + $0x18] sm:$0xff]  ;;  %v1799_v27 = vld [vmem:[#allocation8 + $0x10] sm:$0xff] }
 0x2bc   :  { %v1096_v17 = vpop.eup %1095 }
 0x2bd   :  { %v542_v19 = vadd.f32 1.0, %v1096_v17  ;;  %v1790_v17 = vld [vmem:[#allocation8 + $0x58] sm:$0xff] }
 0x2bf   :  { %v1098_v20 = vpop.eup %1097  ;;  %1099 = vrcp.f32 %v542_v19  ;;  %v554_v39 = vand.u32 2147483648, %v542_v19  ;;  %vm548_vm13 = vweird.f32 %v542_v19  ;;  %v552_v40 = vand.u32 2147483647, %v542_v19 }
 0x2c0   :  { %v525_v23 = vmul.f32 %v1098_v20, %v523_v15  ;;  %1101 = vtanh.f32 %v518_v21  ;;  %vm530_vm8 = vweird.f32 %v1098_v20  ;;  %v1187_v15 = vld [vmem:[#allocation8 + $0x60] sm:$0xff]  ;;  %v1193_v21 = vld [vmem:[#allocation8 + $0x30] sm:$0xff] }
 0x2c1   :  { %vm531_vm10 = vmor %vm529_vm9, %vm530_vm8  ;;  %v555_v47 = vor.u32 1.1754944e-38, %v554_v39  ;;  %vm553_vm15 = vcmp.eq.f32.partialorder %v552_v40, 8.507059e+37 }
 0x2c2   :  { %v526_v24 = vsub.f32 1.0, %v525_v23  ;;  %v1194_v23 = vld [vmem:[#allocation8 + $0x38] sm:$0xff] }
 0x2c4   :  { %v527_v26 = vmul.f32 %v1098_v20, %v526_v24  ;;  %v1796_v24 = vld [vmem:[#allocation8 + $0x28] sm:$0xff] }
 0x2c5   :  { %v1100_v28 = vpop.eup %1099 }
 0x2c6   :  { %v544_v29 = vmul.f32 %v1100_v28, %v542_v19  ;;  %v528_v30 = vadd.f32 %v1098_v20, %v527_v26  ;;  %v1102_v34 = vpop.eup %1101  ;;  %vm549_vm12 = vweird.f32 %v1100_v28  ;;  %v1191_v19 = vld [vmem:[#allocation8 + $0x50] sm:$0xff]  ;;  %v1197_v26 = vld [vmem:[#allocation8 + $0x20] sm:$0xff] }
 0x2c7   :  { %vm550_vm14 = vmor %vm548_vm13, %vm549_vm12 }
 0x2c8   :  { %v545_v32 = vsub.f32 1.0, %v544_v29  ;;  %v532_v33 = vsel %vm531_vm10, %v1098_v20, %v528_v30  ;;  %v1793_v20 = vld [vmem:[#allocation8 + $0x40] sm:$0xff]  ;;  %v1200_v29 = vld [vmem:[#allocation8 + $0x8] sm:$0xff] }
 0x2c9   :  { %v537_v35 = vsel %vm534_vm11, %v536_v31, %v532_v33  ;;  %v565_v30 = vld [vmem:[#allocation3 + $0x4] ss:$8 sm:$0x7] }
 0x2ca   :  { %v559_v36 = vmul.f32 %v1102_v34, %v537_v35  ;;  %v546_v37 = vmul.f32 %v1100_v28, %v545_v32  ;;  %v567_v31 = vperm.slane %v565_v30, 0  ;;  %v568_v32 = vperm.slane %v565_v30, 1 }
 0x2cc   :  { %1103 = vtanh.f32 %v559_v36  ;;  %563 = vst [vmem:[#allocation9 + $0xb] sm:$0x1] %v559_v36  ;;  %v547_v38 = vadd.f32 %v1100_v28, %v546_v37 }
 0x2ce   :  { %v551_v43 = vsel %vm550_vm14, %v1100_v28, %v547_v38  ;;  %v1199_v28 = vld [vmem:[#allocation8] sm:$0xff] }
 0x2cf   :  { %v556_v42 = vsel %vm553_vm15, %v555_v47, %v551_v43 }
 0x2d2   :  { %v1104_v48 = vpop.eup %1103 }
 0x2d3   :  { %v561_v54 = vmul.f32 %v1104_v48, %v556_v42  ;;  %v569_v48 = vperm.slane %v565_v30, 2 }
 0x2d5   :  { %562 = vst [vmem:[#allocation9 + $0x3] sm:$0x1] %v561_v54  ;;  %589 = vmatmul.f32.vlgmr.msrb.gmra.mxu0 %v561_v54  ;;  %609 = vmatmul.f32.vlgmr.msrb.gmra.mxu1 %v561_v54 }
 0x2d6   :  { %629 = vmatmul.f32.vlgmr.msrb.gmra.mxu2 %v561_v54  ;;  %839 = vmatpush.msrb.mxu0 %v1754_v56 }
 0x2d7   :  { %912 = vmatpush.msrb.mxu1 %v1154_v50  ;;  %932 = vmatpush.msrb.mxu2 %v1155_v59 }
 0x2d8   :  { %840 = vmatpush.msrb.mxu0 %v1757_v60 }
 0x2d9   :  { %913 = vmatpush.msrb.mxu1 %v1157_v63  ;;  %933 = vmatpush.msrb.mxu2 %v1158_v22 }
 0x2da   :  { %841 = vmatpush.msrb.mxu0 %v1760_v49 }
 0x2db   :  { %914 = vmatpush.msrb.mxu1 %v1160_v53  ;;  %934 = vmatpush.msrb.mxu2 %v1161_v57 }
 0x2dc   :  { %842 = vmatpush.msrb.mxu0 %v1763_v51 }
 0x2dd   :  { %915 = vmatpush.msrb.mxu1 %v1163_v45  ;;  %935 = vmatpush.msrb.mxu2 %v1164_v46 }
 0x2de   :  { %843 = vmatpush.msrb.mxu0 %v1766_v55 }
 0x2df   :  { %916 = vmatpush.msrb.mxu1 %v1166_v44  ;;  %936 = vmatpush.msrb.mxu2 %v1167_v41 }
 0x2e0   :  { %844 = vmatpush.msrb.mxu0 %v1769_v52 }
 0x2e1   :  { %917 = vmatpush.msrb.mxu1 %v1169_v61  ;;  %937 = vmatpush.msrb.mxu2 %v1170_v62 }
 0x2e2   :  { %845 = vmatpush.msrb.mxu0 %v1772_v58 }
 0x2e3   :  { %918 = vmatpush.msrb.mxu1 %v1172_v0  ;;  %938 = vmatpush.msrb.mxu2 %v1173_v1 }
 0x2e4   :  { %846 = vmatpush.msrb.mxu0 %v1775_v2 }
 0x2e5   :  { %919 = vmatpush.msrb.mxu1 %v1175_v3  ;;  %939 = vmatpush.msrb.mxu2 %v1176_v4 }
 0x2e6   :  { %847 = vmatpush.msrb.mxu0 %v1778_v5 }
 0x2e7   :  { %920 = vmatpush.msrb.mxu1 %v1178_v6  ;;  %940 = vmatpush.msrb.mxu2 %v1179_v7 }
 0x2e8   :  { %848 = vmatpush.msrb.mxu0 %v1781_v8 }
 0x2e9   :  { %921 = vmatpush.msrb.mxu1 %v1181_v9  ;;  %941 = vmatpush.msrb.mxu2 %v1182_v10 }
 0x2ea   :  { %849 = vmatpush.msrb.mxu0 %v1784_v11 }
 0x2eb   :  { %922 = vmatpush.msrb.mxu1 %v1184_v12  ;;  %942 = vmatpush.msrb.mxu2 %v1185_v13 }
 0x2ec   :  { %850 = vmatpush.msrb.mxu0 %v1787_v14 }
 0x2ed   :  { %923 = vmatpush.msrb.mxu1 %v1187_v15  ;;  %943 = vmatpush.msrb.mxu2 %v1188_v16 }
 0x2ee   :  { %851 = vmatpush.msrb.mxu0 %v1790_v17 }
 0x2ef   :  { %924 = vmatpush.msrb.mxu1 %v1190_v18  ;;  %944 = vmatpush.msrb.mxu2 %v1191_v19 }
 0x2f0   :  { %852 = vmatpush.msrb.mxu0 %v1793_v20 }
 0x2f1   :  { %925 = vmatpush.msrb.mxu1 %v1193_v21  ;;  %945 = vmatpush.msrb.mxu2 %v1194_v23 }
 0x2f2   :  { %853 = vmatpush.msrb.mxu0 %v1796_v24 }
 0x2f3   :  { %926 = vmatpush.msrb.mxu1 %v1196_v25  ;;  %946 = vmatpush.msrb.mxu2 %v1197_v26 }
 0x2f4   :  { %854 = vmatpush.msrb.mxu0 %v1799_v27 }
 0x2f5   :  { %927 = vmatpush.msrb.mxu1 %v1199_v28  ;;  %947 = vmatpush.msrb.mxu2 %v1200_v29 }
 0x352   :  { %v590_v33 = vpop.f32.mrf.mxu0  ;;  %v610_v34 = vpop.f32.mrf.mxu1 }
 0x353   :  { %v591_v35 = vadd.f32 %v590_v33, %v567_v31  ;;  %v611_v36 = vadd.f32 %v610_v34, %v568_v32 }
 0x355   :  { %v1043_v37 = vmul.f32 -1.442695, %v591_v35  ;;  %v1044_v38 = vmul.f32 -1.442695, %v611_v36 }
 0x357   :  { %1105 = vpow2.f32 %v1043_v37 }
 0x358   :  { %1107 = vpow2.f32 %v1044_v38 }
 0x359   :  { %v630_v42 = vpop.f32.mrf.mxu2 }
 0x35a   :  { %v631_v50 = vadd.f32 %v630_v42, %v569_v48 }
 0x35d   :  { %v1106_v39 = vpop.eup %1105 }
 0x35e   :  { %v1108_v40 = vpop.eup %1107  ;;  %v636_v43 = vadd.f32 1.0, %v1106_v39 }
 0x35f   :  { %v655_v47 = vadd.f32 1.0, %v1108_v40 }
 0x360   :  { %1109 = vrcp.f32 %v636_v43  ;;  %v648_v45 = vand.u32 2147483648, %v636_v43  ;;  %v646_v44 = vand.u32 2147483647, %v636_v43  ;;  %vm642_vm1 = vweird.f32 %v636_v43 }
 0x361   :  { %1111 = vrcp.f32 %v655_v47  ;;  %v667_v7 = vand.u32 2147483648, %v655_v47  ;;  %vm661_vm5 = vweird.f32 %v655_v47  ;;  %v665_v9 = vand.u32 2147483647, %v655_v47 }
 0x362   :  { %1113 = vtanh.f32 %v631_v50  ;;  %v649_v61 = vor.u32 1.1754944e-38, %v648_v45  ;;  %vm647_vm3 = vcmp.eq.f32.partialorder %v646_v44, 8.507059e+37  ;;  %v791_v50 = vld [vmem:[#allocation3 + $0x6] ss:$8 sm:$0x7] }
 0x363   :  { %v668_v12 = vor.u32 1.1754944e-38, %v667_v7  ;;  %vm666_vm7 = vcmp.eq.f32.partialorder %v665_v9, 8.507059e+37 }
 0x366   :  { %v1110_v54 = vpop.eup %1109 }
 0x367   :  { %v1112_v59 = vpop.eup %1111  ;;  %v638_v63 = vmul.f32 %v1110_v54, %v636_v43  ;;  %vm643_vm0 = vweird.f32 %v1110_v54 }
 0x368   :  { %v657_v22 = vmul.f32 %v1112_v59, %v655_v47  ;;  %vm644_vm2 = vmor %vm642_vm1, %vm643_vm0  ;;  %v1114_v1 = vpop.eup %1113  ;;  %vm662_vm4 = vweird.f32 %v1112_v59 }
 0x369   :  { %v639_v53 = vsub.f32 1.0, %v638_v63  ;;  %vm663_vm6 = vmor %vm661_vm5, %vm662_vm4  ;;  %v794_v63 = vperm.slane %v791_v50, 1 }
 0x36a   :  { %v658_v57 = vsub.f32 1.0, %v657_v22 }
 0x36b   :  { %v640_v46 = vmul.f32 %v1110_v54, %v639_v53 }
 0x36c   :  { %v659_v62 = vmul.f32 %v1112_v59, %v658_v57 }
 0x36d   :  { %v641_v41 = vadd.f32 %v1110_v54, %v640_v46 }
 0x36e   :  { %v660_v6 = vadd.f32 %v1112_v59, %v659_v62 }
 0x36f   :  { %v645_v0 = vsel %vm644_vm2, %v1110_v54, %v641_v41 }
 0x370   :  { %v650_v3 = vsel %vm647_vm3, %v649_v61, %v645_v0  ;;  %v664_v10 = vsel %vm663_vm6, %v1112_v59, %v660_v6  ;;  %v793_v59 = vperm.slane %v791_v50, 0 }
 0x371   :  { %v672_v4 = vmul.f32 %v1114_v1, %v650_v3  ;;  %v669_v15 = vsel %vm666_vm7, %v668_v12, %v664_v10  ;;  %v795_v1 = vperm.slane %v791_v50, 2 }
 0x373   :  { %1115 = vtanh.f32 %v672_v4  ;;  %676 = vst [vmem:[#allocation9 + $0xc] sm:$0x1] %v672_v4 }
 0x379   :  { %v1116_v13 = vpop.eup %1115 }
 0x37a   :  { %v674_v16 = vmul.f32 %v1116_v13, %v669_v15 }
 0x37c   :  { %675 = vst [vmem:[#allocation9 + $0x4] sm:$0x1] %v674_v16  ;;  %702 = vmatmul.f32.vlgmr.msrb.gmra.mxu3 %v674_v16  ;;  %722 = vmatmul.f32.vlgmr.msra.gmra.mxu0 %v674_v16 }
 0x37d   :  { %742 = vmatmul.f32.vlgmr.msra.gmra.mxu1 %v674_v16  ;;  %952 = vmatpush.msrb.mxu3 %v1754_v56  ;;  %v678_v56 = vld [vmem:[#allocation3 + $0x5] ss:$8 sm:$0x7] }
 0x37e   :  { %v682_v18 = vperm.slane %v678_v56, 2 }
 0x37f   :  { %953 = vmatpush.msrb.mxu3 %v1757_v60  ;;  %v681_v60 = vperm.slane %v678_v56, 1 }
 0x381   :  { %954 = vmatpush.msrb.mxu3 %v1760_v49 }
 0x383   :  { %955 = vmatpush.msrb.mxu3 %v1763_v51 }
 0x385   :  { %956 = vmatpush.msrb.mxu3 %v1766_v55 }
 0x387   :  { %957 = vmatpush.msrb.mxu3 %v1769_v52  ;;  %v680_v52 = vperm.slane %v678_v56, 0 }
 0x389   :  { %958 = vmatpush.msrb.mxu3 %v1772_v58 }
 0x38b   :  { %959 = vmatpush.msrb.mxu3 %v1775_v2 }
 0x38d   :  { %960 = vmatpush.msrb.mxu3 %v1778_v5 }
 0x38f   :  { %961 = vmatpush.msrb.mxu3 %v1781_v8 }
 0x391   :  { %962 = vmatpush.msrb.mxu3 %v1784_v11 }
 0x393   :  { %963 = vmatpush.msrb.mxu3 %v1787_v14 }
 0x395   :  { %964 = vmatpush.msrb.mxu3 %v1790_v17 }
 0x397   :  { %965 = vmatpush.msrb.mxu3 %v1793_v20 }
 0x399   :  { %966 = vmatpush.msrb.mxu3 %v1796_v24 }
 0x39b   :  { %967 = vmatpush.msrb.mxu3 %v1799_v27 }
 0x3f9   :  { %v723_v49 = vpop.f32.mrf.mxu0 }
 0x3fa   :  { %v724_v51 = vadd.f32 %v723_v49, %v681_v60  ;;  %v743_v20 = vpop.f32.mrf.mxu1 }
 0x3fb   :  { %v744_v24 = vadd.f32 %v743_v20, %v682_v18 }
 0x3fc   :  { %v1046_v55 = vmul.f32 -1.442695, %v724_v51 }
 0x3fe   :  { %1117 = vpow2.f32 %v1046_v55 }
 0x3ff   :  { %v703_v58 = vpop.f32.mrf.mxu3 }
 0x400   :  { %v704_v2 = vadd.f32 %v703_v58, %v680_v52 }
 0x402   :  { %v1045_v5 = vmul.f32 -1.442695, %v704_v2 }
 0x404   :  { %v1118_v8 = vpop.eup %1117  ;;  %1119 = vpow2.f32 %v1045_v5 }
 0x405   :  { %v768_v11 = vadd.f32 1.0, %v1118_v8 }
 0x407   :  { %1121 = vrcp.f32 %v768_v11  ;;  %v780_v39 = vand.u32 2147483648, %v768_v11  ;;  %vm774_vm13 = vweird.f32 %v768_v11  ;;  %v778_v40 = vand.u32 2147483647, %v768_v11 }
 0x409   :  { %v781_v47 = vor.u32 1.1754944e-38, %v780_v39  ;;  %vm779_vm15 = vcmp.eq.f32.partialorder %v778_v40, 8.507059e+37 }
 0x40a   :  { %v1120_v14 = vpop.eup %1119 }
 0x40b   :  { %v749_v17 = vadd.f32 1.0, %v1120_v14 }
 0x40d   :  { %1123 = vrcp.f32 %v749_v17  ;;  %v1122_v19 = vpop.eup %1121  ;;  %v761_v28 = vand.u32 2147483648, %v749_v17  ;;  %v759_v30 = vand.u32 2147483647, %v749_v17  ;;  %vm755_vm9 = vweird.f32 %v749_v17 }
 0x40e   :  { %v770_v23 = vmul.f32 %v1122_v19, %v768_v11  ;;  %1125 = vtanh.f32 %v744_v24  ;;  %vm775_vm12 = vweird.f32 %v1122_v19 }
 0x40f   :  { %v762_v32 = vor.u32 1.1754944e-38, %v761_v28  ;;  %vm760_vm11 = vcmp.eq.f32.partialorder %v759_v30, 8.507059e+37  ;;  %vm776_vm14 = vmor %vm774_vm13, %vm775_vm12 }
 0x410   :  { %v771_v27 = vsub.f32 1.0, %v770_v23 }
 0x412   :  { %v772_v33 = vmul.f32 %v1122_v19, %v771_v27 }
 0x413   :  { %v1124_v21 = vpop.eup %1123 }
 0x414   :  { %v751_v25 = vmul.f32 %v1124_v21, %v749_v17  ;;  %vm756_vm8 = vweird.f32 %v1124_v21  ;;  %v1126_v35 = vpop.eup %1125  ;;  %v773_v38 = vadd.f32 %v1122_v19, %v772_v33 }
 0x415   :  { %vm757_vm10 = vmor %vm755_vm9, %vm756_vm8 }
 0x416   :  { %v752_v26 = vsub.f32 1.0, %v751_v25  ;;  %v777_v43 = vsel %vm776_vm14, %v1122_v19, %v773_v38 }
 0x417   :  { %v782_v42 = vsel %vm779_vm15, %v781_v47, %v777_v43 }
 0x418   :  { %v753_v29 = vmul.f32 %v1124_v21, %v752_v26 }
 0x41a   :  { %v754_v31 = vadd.f32 %v1124_v21, %v753_v29 }
 0x41c   :  { %v758_v34 = vsel %vm757_vm10, %v1124_v21, %v754_v31  ;;  %v904_v21 = vld [vmem:[#allocation3 + $0x7] ss:$8 sm:$0x7] }
 0x41d   :  { %v763_v36 = vsel %vm760_vm11, %v762_v32, %v758_v34  ;;  %v906_v23 = vperm.slane %v904_v21, 0  ;;  %v907_v27 = vperm.slane %v904_v21, 1  ;;  %v908_v33 = vperm.slane %v904_v21, 2 }
 0x41e   :  { %v785_v37 = vmul.f32 %v1126_v35, %v763_v36 }
 0x420   :  { %1127 = vtanh.f32 %v785_v37  ;;  %789 = vst [vmem:[#allocation9 + $0xd] sm:$0x1] %v785_v37 }
 0x426   :  { %v1128_v48 = vpop.eup %1127 }
 0x427   :  { %v787_v54 = vmul.f32 %v1128_v48, %v782_v42 }
 0x429   :  { %788 = vst [vmem:[#allocation9 + $0x5] sm:$0x1] %v787_v54  ;;  %815 = vmatmul.f32.vlgmr.msra.gmra.mxu2 %v787_v54  ;;  %835 = vmatmul.f32.vlgmr.msra.gmra.mxu3 %v787_v54 }
 0x42a   :  { %855 = vmatmul.f32.vlgmr.msrb.gmra.mxu0 %v787_v54 }
 0x4a7   :  { %v856_v3 = vpop.f32.mrf.mxu0 }
 0x4a8   :  { %v857_v6 = vadd.f32 %v856_v3, %v795_v1 }
 0x4ac   :  { %v816_v22 = vpop.f32.mrf.mxu2  ;;  %v836_v53 = vpop.f32.mrf.mxu3 }
 0x4ad   :  { %v817_v57 = vadd.f32 %v816_v22, %v793_v59  ;;  %v837_v45 = vadd.f32 %v836_v53, %v794_v63 }
 0x4af   :  { %v1047_v46 = vmul.f32 -1.442695, %v817_v57  ;;  %v1048_v44 = vmul.f32 -1.442695, %v837_v45 }
 0x4b1   :  { %1129 = vpow2.f32 %v1047_v46 }
 0x4b2   :  { %1131 = vpow2.f32 %v1048_v44 }
 0x4b7   :  { %v1130_v41 = vpop.eup %1129 }
 0x4b8   :  { %v1132_v61 = vpop.eup %1131  ;;  %v862_v62 = vadd.f32 1.0, %v1130_v41 }
 0x4b9   :  { %v881_v0 = vadd.f32 1.0, %v1132_v61 }
 0x4ba   :  { %1133 = vrcp.f32 %v862_v62  ;;  %v874_v13 = vand.u32 2147483648, %v862_v62  ;;  %v872_v56 = vand.u32 2147483647, %v862_v62  ;;  %vm868_vm1 = vweird.f32 %v862_v62 }
 0x4bb   :  { %1135 = vrcp.f32 %v881_v0  ;;  %v893_v8 = vand.u32 2147483648, %v881_v0  ;;  %vm887_vm5 = vweird.f32 %v881_v0  ;;  %v891_v11 = vand.u32 2147483647, %v881_v0 }
 0x4bc   :  { %1137 = vtanh.f32 %v857_v6  ;;  %v875_v49 = vor.u32 1.1754944e-38, %v874_v13  ;;  %vm873_vm3 = vcmp.eq.f32.partialorder %v872_v56, 8.507059e+37 }
 0x4bd   :  { %v894_v17 = vor.u32 1.1754944e-38, %v893_v8  ;;  %vm892_vm7 = vcmp.eq.f32.partialorder %v891_v11, 8.507059e+37 }
 0x4c0   :  { %v1134_v4 = vpop.eup %1133 }
 0x4c1   :  { %v1136_v7 = vpop.eup %1135  ;;  %v864_v9 = vmul.f32 %v1134_v4, %v862_v62  ;;  %vm869_vm0 = vweird.f32 %v1134_v4 }
 0x4c2   :  { %v883_v10 = vmul.f32 %v1136_v7, %v881_v0  ;;  %vm870_vm2 = vmor %vm868_vm1, %vm869_vm0  ;;  %v1138_v52 = vpop.eup %1137  ;;  %vm888_vm4 = vweird.f32 %v1136_v7 }
 0x4c3   :  { %v865_v12 = vsub.f32 1.0, %v864_v9  ;;  %vm889_vm6 = vmor %vm887_vm5, %vm888_vm4 }
 0x4c4   :  { %v884_v15 = vsub.f32 1.0, %v883_v10 }
 0x4c5   :  { %v866_v16 = vmul.f32 %v1134_v4, %v865_v12 }
 0x4c6   :  { %v885_v51 = vmul.f32 %v1136_v7, %v884_v15 }
 0x4c7   :  { %v867_v60 = vadd.f32 %v1134_v4, %v866_v16 }
 0x4c8   :  { %v886_v5 = vadd.f32 %v1136_v7, %v885_v51 }
 0x4c9   :  { %v871_v55 = vsel %vm870_vm2, %v1134_v4, %v867_v60 }
 0x4ca   :  { %v876_v58 = vsel %vm873_vm3, %v875_v49, %v871_v55  ;;  %v890_v14 = vsel %vm889_vm6, %v1136_v7, %v886_v5 }
 0x4cb   :  { %v898_v2 = vmul.f32 %v1138_v52, %v876_v58  ;;  %v895_v19 = vsel %vm892_vm7, %v894_v17, %v890_v14 }
 0x4cd   :  { %1139 = vtanh.f32 %v898_v2  ;;  %902 = vst [vmem:[#allocation9 + $0xe] sm:$0x1] %v898_v2 }
 0x4d3   :  { %v1140_v18 = vpop.eup %1139 }
 0x4d4   :  { %v900_v20 = vmul.f32 %v1140_v18, %v895_v19 }
 0x4d6   :  { %901 = vst [vmem:[#allocation9 + $0x6] sm:$0x1] %v900_v20  ;;  %928 = vmatmul.f32.vlgmr.msrb.gmra.mxu1 %v900_v20  ;;  %948 = vmatmul.f32.vlgmr.msrb.gmra.mxu2 %v900_v20 }
 0x4d7   :  { %968 = vmatmul.f32.vlgmr.msrb.gmra.mxu3 %v900_v20 }
 0x553   :  { %v929_v24 = vpop.f32.mrf.mxu1 }
 0x554   :  { %v930_v25 = vadd.f32 %v929_v24, %v906_v23 }
 0x556   :  { %v1049_v26 = vmul.f32 -1.442695, %v930_v25 }
 0x558   :  { %1141 = vpow2.f32 %v1049_v26 }
 0x559   :  { %v949_v28 = vpop.f32.mrf.mxu2 }
 0x55a   :  { %v950_v29 = vadd.f32 %v949_v28, %v907_v27  ;;  %v969_v35 = vpop.f32.mrf.mxu3 }
 0x55b   :  { %v970_v38 = vadd.f32 %v969_v35, %v908_v33 }
 0x55c   :  { %v1050_v30 = vmul.f32 -1.442695, %v950_v29 }
 0x55e   :  { %v1142_v31 = vpop.eup %1141  ;;  %1143 = vpow2.f32 %v1050_v30 }
 0x55f   :  { %v975_v32 = vadd.f32 1.0, %v1142_v31 }
 0x561   :  { %1145 = vrcp.f32 %v975_v32  ;;  %v987_v43 = vand.u32 2147483648, %v975_v32  ;;  %v985_v48 = vand.u32 2147483647, %v975_v32  ;;  %vm981_vm9 = vweird.f32 %v975_v32 }
 0x563   :  { %v988_v59 = vor.u32 1.1754944e-38, %v987_v43  ;;  %vm986_vm11 = vcmp.eq.f32.partialorder %v985_v48, 8.507059e+37 }
 0x564   :  { %v1144_v34 = vpop.eup %1143 }
 0x565   :  { %v994_v36 = vadd.f32 1.0, %v1144_v34 }
 0x567   :  { %v1146_v37 = vpop.eup %1145  ;;  %1147 = vrcp.f32 %v994_v36  ;;  %v1006_v41 = vand.u32 2147483648, %v994_v36  ;;  %vm1000_vm13 = vweird.f32 %v994_v36  ;;  %v1004_v61 = vand.u32 2147483647, %v994_v36 }
 0x568   :  { %v977_v39 = vmul.f32 %v1146_v37, %v975_v32  ;;  %1149 = vtanh.f32 %v970_v38  ;;  %vm982_vm8 = vweird.f32 %v1146_v37 }
 0x569   :  { %vm983_vm10 = vmor %vm981_vm9, %vm982_vm8  ;;  %v1007_v0 = vor.u32 1.1754944e-38, %v1006_v41  ;;  %vm1005_vm15 = vcmp.eq.f32.partialorder %v1004_v61, 8.507059e+37 }
 0x56a   :  { %v978_v40 = vsub.f32 1.0, %v977_v39 }
 0x56c   :  { %v979_v47 = vmul.f32 %v1146_v37, %v978_v40 }
 0x56d   :  { %v1148_v42 = vpop.eup %1147 }
 0x56e   :  { %v996_v54 = vmul.f32 %v1148_v42, %v994_v36  ;;  %v980_v50 = vadd.f32 %v1146_v37, %v979_v47  ;;  %v1150_v53 = vpop.eup %1149  ;;  %vm1001_vm12 = vweird.f32 %v1148_v42 }
 0x56f   :  { %vm1002_vm14 = vmor %vm1000_vm13, %vm1001_vm12 }
 0x570   :  { %v997_v63 = vsub.f32 1.0, %v996_v54  ;;  %v984_v22 = vsel %vm983_vm10, %v1146_v37, %v980_v50 }
 0x571   :  { %v989_v57 = vsel %vm986_vm11, %v988_v59, %v984_v22 }
 0x572   :  { %v998_v45 = vmul.f32 %v1148_v42, %v997_v63  ;;  %v1011_v46 = vmul.f32 %v1150_v53, %v989_v57 }
 0x574   :  { %v999_v44 = vadd.f32 %v1148_v42, %v998_v45  ;;  %1151 = vtanh.f32 %v1011_v46  ;;  %1015 = vst [vmem:[#allocation9 + $0xf] sm:$0x1] %v1011_v46 }
 0x576   :  { %v1003_v62 = vsel %vm1002_vm14, %v1148_v42, %v999_v44 }
 0x577   :  { %v1008_v3 = vsel %vm1005_vm15, %v1007_v0, %v1003_v62 }
 0x57a   :  { %v1152_v1 = vpop.eup %1151 }
 0x57b   :  { %v1013_v4 = vmul.f32 %v1152_v1, %v1008_v3 }
 0x57d   :  { %1014 = vst [vmem:[#allocation9 + $0x7] sm:$0x1] %v1013_v4 }
 0x57e   :  { %1016 = vst [vmem:[#allocation2] sm:$0x1] %v1013_v4  ;;  %1027 = dma.vmem_to_hbm [thread:$0]  %s1023_s2, 256, %s1025_s30, [#allocation5]  }
 0x57f   :  { %1301 = dma.done.wait [#allocation5], 256  }
 0x580   :  { %1302 = vsyncadd [#allocation5], 4294967040 }
 0x581   :  { %1032 = vsyncpa [#allocation4], 1 }
 0x582   :  { %1033 = vsyncpa [#allocation7], 1 }
 0x583   :  { %1034 = vsyncpa [#allocation5], 1 }

</bundles_post_ra>
